<compile_context>
chip_gen: v7x
topology: tpu7x:2x2x1
jax: 0.10.0
libtpu: 0.0.40
codegen_flags: <defaults>
</compile_context>

<pallas_src>
import jax
import jax.numpy as jnp
from jax import lax
from jax.experimental import pallas as pl
from jax.experimental.pallas import tpu as pltpu


def _sigmoid_via_tanh(x):
    # One EUP op + cheap VPU ops; avoids exp + divide on the serial chain.
    return 0.5 * jnp.tanh(0.5 * x) + 0.5


def _lstm_kernel(x_ref, wih_ref, whh_ref, b_ref, out_ref, gx_ref):
    """Full-W LSTM recurrence for one batch tile (batch on lanes)."""
    w_len = x_ref.shape[0]
    hout = out_ref.shape[0]
    tile_n = out_ref.shape[1]

    wih = wih_ref[...]            # (4*Hout, D)
    whh = whh_ref[...]            # (4*Hout, Hout)
    bias = b_ref[...]             # (4*Hout, tile_n)  -- already broadcast on lanes

    unroll = bool(w_len <= 32)

    # ---- 1) Input projection for ALL time steps (off the recurrent critical path).
    #      gx[t] = W_ih @ x_t + (b_ih + b_hh)   -> (4*Hout, tile_n)
    def proj_body(t, carry):
        gx_ref[t] = (
            jnp.dot(wih, x_ref[t], preferred_element_type=jnp.float32) + bias
        )
        return carry

    lax.fori_loop(0, w_len, proj_body, 0, unroll=unroll)

    # ---- 2) Sequential recurrence over W; h/c carried in vregs.
    def step(t, carry):
        h_prev, c_prev = carry
        gates = gx_ref[t] + jnp.dot(
            whh, h_prev, preferred_element_type=jnp.float32
        )                                                  # (4*Hout, tile_n)
        i_g = _sigmoid_via_tanh(gates[0 * hout:1 * hout])  # sublane-aligned slices
        f_g = _sigmoid_via_tanh(gates[1 * hout:2 * hout])
        g_g = jnp.tanh(gates[2 * hout:3 * hout])
        o_g = _sigmoid_via_tanh(gates[3 * hout:4 * hout])
        c_new = f_g * c_prev + i_g * g_g
        h_new = o_g * jnp.tanh(c_new)
        return (h_new, c_new)

    h0 = jnp.zeros((hout, tile_n), jnp.float32)
    c0 = jnp.zeros((hout, tile_n), jnp.float32)
    _, c_fin = lax.fori_loop(0, w_len, step, (h0, c0), unroll=unroll)

    # Module returns the final CELL state c_n.  Lane-dense store.
    out_ref[...] = c_fin.astype(out_ref.dtype)


def _round_up(x, m):
    return ((x + m - 1) // m) * m


def bdhw_lstm_to_bdh(img, w_ih, w_hh, b_ih, b_hh, *, tile_n_target=256):
    """JAX/Pallas equivalent of BDHW_LSTM_to_BDH.forward.

    img:  (B, D, H, W) float
    w_ih: (4*Hout, D)   PyTorch LSTM weight_ih_l0 layout ([i, f, g, o])
    w_hh: (4*Hout, Hout)
    b_ih, b_hh: (4*Hout,)
    returns: (B, Hout, H)
    """
    b, d, h, w = img.shape
    hout = w_hh.shape[1]
    n = b * h
    n_gates = 4 * hout

    # BDHW -> (W, D, B*H): fused batch axis goes on LANES.
    # (Wrapper-side transpose is one extra HBM pass; unavoidable given NCHW input.)
    seq = jnp.transpose(img, (3, 1, 0, 2)).reshape(w, d, n).astype(jnp.float32)

    # Pad the fused batch (lane) axis to a multiple of 128.
    n_pad = max(_round_up(n, 128), 128)
    # Tile choice: lane-width multiple of 128; prefer >=2 tiles (v7x has 2 TCs).
    if n_pad % 256 == 0 and n_pad // 256 >= 2 and tile_n_target >= 256:
        tile_n = 256
    else:
        tile_n = 128
    pad = n_pad - n
    seq_p = jnp.pad(seq, ((0, 0), (0, 0), (0, pad))) if pad else seq

    # Weights stay in PyTorch orientation (4*Hout, D)/(4*Hout, Hout): gates = W @ x.
    # TODO(synk): cast weights/x to bf16 on v6e/v7x for MXU throughput (keep f32 state).
    wih = w_ih.astype(jnp.float32)
    whh = w_hh.astype(jnp.float32)
    bias = jnp.broadcast_to(
        (b_ih + b_hh).astype(jnp.float32).reshape(n_gates, 1), (n_gates, tile_n)
    )

    grid = (n_pad // tile_n,)

    c_final = pl.pallas_call(
        _lstm_kernel,
        out_shape=jax.ShapeDtypeStruct((hout, n_pad), jnp.float32),
        grid_spec=pltpu.PrefetchScalarGridSpec(
            num_scalar_prefetch=0,
            grid=grid,
            in_specs=[
                # full-W input slab per batch tile (one big DMA, lane = batch)
                pl.BlockSpec((w, d, tile_n), lambda i: (0, 0, i)),
                # weights / bias: constant block index -> VMEM-resident
                pl.BlockSpec((n_gates, d), lambda i: (0, 0)),
                pl.BlockSpec((n_gates, hout), lambda i: (0, 0)),
                pl.BlockSpec((n_gates, tile_n), lambda i: (0, 0)),
            ],
            out_specs=pl.BlockSpec((hout, tile_n), lambda i: (0, i)),
            scratch_shapes=[
                # precomputed input projections gx[t] for all time steps
                pltpu.VMEM((w, n_gates, tile_n), jnp.float32),
            ],
        ),
        compiler_params=pltpu.CompilerParams(
            dimension_semantics=("parallel",),
        ),
    )(seq_p, wih, whh, bias)

    # (Hout, B*H) -> (B, Hout, H)   ('BHD' -> 'BDH')
    state = c_final[:, :n].reshape(hout, b, h)
    return jnp.transpose(state, (1, 0, 2))


def _lstm_ref(seq, wih_t, whh_t, bias):
    """Pure-JAX reference (lax.scan) returning the final cell state.

    seq: (W, N, D); wih_t: (D, 4H); whh_t: (Hout, 4H); bias: (4H,)
    """
    n = seq.shape[1]
    hout = whh_t.shape[0]

    def step(carry, x_t):
        h_prev, c_prev = carry
        gates = x_t @ wih_t + h_prev @ whh_t + bias
        i_g, f_g, g_g, o_g = jnp.split(gates, 4, axis=-1)
        i_g = jax.nn.sigmoid(i_g)
        f_g = jax.nn.sigmoid(f_g)
        g_g = jnp.tanh(g_g)
        o_g = jax.nn.sigmoid(o_g)
        c_new = f_g * c_prev + i_g * g_g
        h_new = o_g * jnp.tanh(c_new)
        return (h_new, c_new), None

    init = (jnp.zeros((n, hout), jnp.float32), jnp.zeros((n, hout), jnp.float32))
    (_, c_final), _ = lax.scan(step, init, seq)
    return c_final


if __name__ == "__main__":
    key = jax.random.PRNGKey(0)
    B, D, Himg, W = 2, 4, 16, 8
    Hout = 32

    k1, k2, k3, k4, k5 = jax.random.split(key, 5)
    img = jax.random.normal(k1, (B, D, Himg, W), dtype=jnp.float32)
    s = 1.0 / jnp.sqrt(jnp.float32(Hout))
    w_ih = jax.random.uniform(k2, (4 * Hout, D), jnp.float32, -s, s)
    w_hh = jax.random.uniform(k3, (4 * Hout, Hout), jnp.float32, -s, s)
    b_ih = jax.random.uniform(k4, (4 * Hout,), jnp.float32, -s, s)
    b_hh = jax.random.uniform(k5, (4 * Hout,), jnp.float32, -s, s)

    out = bdhw_lstm_to_bdh(img, w_ih, w_hh, b_ih, b_hh)
    out = jax.block_until_ready(out)
    assert out.shape == (B, Hout, Himg), out.shape

    # Verify against a pure-JAX LSTM scan reference.
    seq_ref = jnp.transpose(img, (3, 0, 2, 1)).reshape(W, B * Himg, D)
    c_ref = _lstm_ref(seq_ref, w_ih.T, w_hh.T, (b_ih + b_hh))
    ref = jnp.transpose(c_ref.reshape(B, Himg, Hout), (0, 2, 1))
    assert jnp.allclose(out, ref, atol=1e-4, rtol=1e-4), float(
        jnp.max(jnp.abs(out - ref))
    )

    print("KERNEL_OK")
</pallas_src>

<mosaic_0001>
module attributes {stable_mosaic.version = 11 : i64} {
  func.func @_lstm_kernel(%arg0: i32, %arg1: memref<8x4x128xf32, #tpu.memory_space<vmem>>, %arg2: memref<128x4xf32, #tpu.memory_space<vmem>>, %arg3: memref<128x32xf32, #tpu.memory_space<vmem>>, %arg4: memref<128x128xf32, #tpu.memory_space<vmem>>, %arg5: memref<32x128xf32, #tpu.memory_space<vmem>>, %arg6: memref<8x128x128xf32, #tpu.memory_space<vmem>>) attributes {dimension_semantics = [#tpu.dimension_semantics<parallel>], iteration_bounds = array<i64: 1>, scalar_prefetch = 0 : i64, scratch_operands = 1 : i64, tpu.core_type = #tpu.core_type<tc>, window_params = [{transform_indices = @transform_0, window_bounds = array<i64: 8, 4, 128>}, {pipeline_mode = #tpu.pipeline_mode<synchronous>, transform_indices = @transform_1, window_bounds = array<i64: 128, 4>}, {pipeline_mode = #tpu.pipeline_mode<synchronous>, transform_indices = @transform_2, window_bounds = array<i64: 128, 32>}, {pipeline_mode = #tpu.pipeline_mode<synchronous>, transform_indices = @transform_3, window_bounds = array<i64: 128, 128>}, {transform_indices = @transform_4, window_bounds = array<i64: 32, 128>}]} {
    %c0 = arith.constant 0 : index
    %c0_0 = arith.constant 0 : index
    %0 = vector.load %arg2[%c0, %c0_0] : memref<128x4xf32, #tpu.memory_space<vmem>>, vector<128x4xf32>
    %c0_1 = arith.constant 0 : index
    %c0_2 = arith.constant 0 : index
    %1 = vector.load %arg3[%c0_1, %c0_2] : memref<128x32xf32, #tpu.memory_space<vmem>>, vector<128x32xf32>
    %c0_3 = arith.constant 0 : index
    %c0_4 = arith.constant 0 : index
    %2 = vector.load %arg4[%c0_3, %c0_4] : memref<128x128xf32, #tpu.memory_space<vmem>>, vector<128x128xf32>
    %c0_i32 = arith.constant 0 : i32
    %3 = arith.index_cast %c0_i32 : i32 to index
    %c0_5 = arith.constant 0 : index
    %c0_6 = arith.constant 0 : index
    %4 = vector.load %arg1[%3, %c0_5, %c0_6] : memref<8x4x128xf32, #tpu.memory_space<vmem>>, vector<1x4x128xf32>
    %5 = vector.shape_cast %4 : vector<1x4x128xf32> to vector<4x128xf32>
    %cst = arith.constant dense<0.000000e+00> : vector<128x128xf32>
    %6 = tpu.matmul %0, %5, %cst {dimension_numbers = #tpu.dot_dimension_numbers<[1], [0], [0], [1], [0, 0, 1, 1], [], []>} : vector<128x4xf32>, vector<4x128xf32>, vector<128x128xf32> -> vector<128x128xf32>
    %7 = arith.addf %6, %2 : vector<128x128xf32>
    %8 = arith.index_cast %c0_i32 : i32 to index
    %c0_7 = arith.constant 0 : index
    %c0_8 = arith.constant 0 : index
    %9 = vector.load %arg6[%8, %c0_7, %c0_8] : memref<8x128x128xf32, #tpu.memory_space<vmem>>, vector<1x128x128xf32>
    %10 = vector.shape_cast %9 : vector<1x128x128xf32> to vector<128x128xf32>
    %11 = vector.shape_cast %7 : vector<128x128xf32> to vector<1x128x128xf32>
    tpu.vector_store %arg6[%8, %c0_7, %c0_8], %11 {strides = array<i32>} : memref<8x128x128xf32, #tpu.memory_space<vmem>>, vector<1x128x128xf32>,
    %c1_i32 = arith.constant 1 : i32
    %12 = arith.index_cast %c1_i32 : i32 to index
    %c0_9 = arith.constant 0 : index
    %c0_10 = arith.constant 0 : index
    %13 = vector.load %arg1[%12, %c0_9, %c0_10] : memref<8x4x128xf32, #tpu.memory_space<vmem>>, vector<1x4x128xf32>
    %14 = vector.shape_cast %13 : vector<1x4x128xf32> to vector<4x128xf32>
    %cst_11 = arith.constant dense<0.000000e+00> : vector<128x128xf32>
    %15 = tpu.matmul %0, %14, %cst_11 {dimension_numbers = #tpu.dot_dimension_numbers<[1], [0], [0], [1], [0, 0, 1, 1], [], []>} : vector<128x4xf32>, vector<4x128xf32>, vector<128x128xf32> -> vector<128x128xf32>
    %16 = arith.addf %15, %2 : vector<128x128xf32>
    %17 = arith.index_cast %c1_i32 : i32 to index
    %c0_12 = arith.constant 0 : index
    %c0_13 = arith.constant 0 : index
    %18 = vector.load %arg6[%17, %c0_12, %c0_13] : memref<8x128x128xf32, #tpu.memory_space<vmem>>, vector<1x128x128xf32>
    %19 = vector.shape_cast %18 : vector<1x128x128xf32> to vector<128x128xf32>
    %20 = vector.shape_cast %16 : vector<128x128xf32> to vector<1x128x128xf32>
    tpu.vector_store %arg6[%17, %c0_12, %c0_13], %20 {strides = array<i32>} : memref<8x128x128xf32, #tpu.memory_space<vmem>>, vector<1x128x128xf32>,
    %c2_i32 = arith.constant 2 : i32
    %21 = arith.index_cast %c2_i32 : i32 to index
    %c0_14 = arith.constant 0 : index
    %c0_15 = arith.constant 0 : index
    %22 = vector.load %arg1[%21, %c0_14, %c0_15] : memref<8x4x128xf32, #tpu.memory_space<vmem>>, vector<1x4x128xf32>
    %23 = vector.shape_cast %22 : vector<1x4x128xf32> to vector<4x128xf32>
    %cst_16 = arith.constant dense<0.000000e+00> : vector<128x128xf32>
    %24 = tpu.matmul %0, %23, %cst_16 {dimension_numbers = #tpu.dot_dimension_numbers<[1], [0], [0], [1], [0, 0, 1, 1], [], []>} : vector<128x4xf32>, vector<4x128xf32>, vector<128x128xf32> -> vector<128x128xf32>
    %25 = arith.addf %24, %2 : vector<128x128xf32>
    %26 = arith.index_cast %c2_i32 : i32 to index
    %c0_17 = arith.constant 0 : index
    %c0_18 = arith.constant 0 : index
    %27 = vector.load %arg6[%26, %c0_17, %c0_18] : memref<8x128x128xf32, #tpu.memory_space<vmem>>, vector<1x128x128xf32>
    %28 = vector.shape_cast %27 : vector<1x128x128xf32> to vector<128x128xf32>
    %29 = vector.shape_cast %25 : vector<128x128xf32> to vector<1x128x128xf32>
    tpu.vector_store %arg6[%26, %c0_17, %c0_18], %29 {strides = array<i32>} : memref<8x128x128xf32, #tpu.memory_space<vmem>>, vector<1x128x128xf32>,
    %c3_i32 = arith.constant 3 : i32
    %30 = arith.index_cast %c3_i32 : i32 to index
    %c0_19 = arith.constant 0 : index
    %c0_20 = arith.constant 0 : index
    %31 = vector.load %arg1[%30, %c0_19, %c0_20] : memref<8x4x128xf32, #tpu.memory_space<vmem>>, vector<1x4x128xf32>
    %32 = vector.shape_cast %31 : vector<1x4x128xf32> to vector<4x128xf32>
    %cst_21 = arith.constant dense<0.000000e+00> : vector<128x128xf32>
    %33 = tpu.matmul %0, %32, %cst_21 {dimension_numbers = #tpu.dot_dimension_numbers<[1], [0], [0], [1], [0, 0, 1, 1], [], []>} : vector<128x4xf32>, vector<4x128xf32>, vector<128x128xf32> -> vector<128x128xf32>
    %34 = arith.addf %33, %2 : vector<128x128xf32>
    %35 = arith.index_cast %c3_i32 : i32 to index
    %c0_22 = arith.constant 0 : index
    %c0_23 = arith.constant 0 : index
    %36 = vector.load %arg6[%35, %c0_22, %c0_23] : memref<8x128x128xf32, #tpu.memory_space<vmem>>, vector<1x128x128xf32>
    %37 = vector.shape_cast %36 : vector<1x128x128xf32> to vector<128x128xf32>
    %38 = vector.shape_cast %34 : vector<128x128xf32> to vector<1x128x128xf32>
    tpu.vector_store %arg6[%35, %c0_22, %c0_23], %38 {strides = array<i32>} : memref<8x128x128xf32, #tpu.memory_space<vmem>>, vector<1x128x128xf32>,
    %c4_i32 = arith.constant 4 : i32
    %39 = arith.index_cast %c4_i32 : i32 to index
    %c0_24 = arith.constant 0 : index
    %c0_25 = arith.constant 0 : index
    %40 = vector.load %arg1[%39, %c0_24, %c0_25] : memref<8x4x128xf32, #tpu.memory_space<vmem>>, vector<1x4x128xf32>
    %41 = vector.shape_cast %40 : vector<1x4x128xf32> to vector<4x128xf32>
    %cst_26 = arith.constant dense<0.000000e+00> : vector<128x128xf32>
    %42 = tpu.matmul %0, %41, %cst_26 {dimension_numbers = #tpu.dot_dimension_numbers<[1], [0], [0], [1], [0, 0, 1, 1], [], []>} : vector<128x4xf32>, vector<4x128xf32>, vector<128x128xf32> -> vector<128x128xf32>
    %43 = arith.addf %42, %2 : vector<128x128xf32>
    %44 = arith.index_cast %c4_i32 : i32 to index
    %c0_27 = arith.constant 0 : index
    %c0_28 = arith.constant 0 : index
    %45 = vector.load %arg6[%44, %c0_27, %c0_28] : memref<8x128x128xf32, #tpu.memory_space<vmem>>, vector<1x128x128xf32>
    %46 = vector.shape_cast %45 : vector<1x128x128xf32> to vector<128x128xf32>
    %47 = vector.shape_cast %43 : vector<128x128xf32> to vector<1x128x128xf32>
    tpu.vector_store %arg6[%44, %c0_27, %c0_28], %47 {strides = array<i32>} : memref<8x128x128xf32, #tpu.memory_space<vmem>>, vector<1x128x128xf32>,
    %c5_i32 = arith.constant 5 : i32
    %48 = arith.index_cast %c5_i32 : i32 to index
    %c0_29 = arith.constant 0 : index
    %c0_30 = arith.constant 0 : index
    %49 = vector.load %arg1[%48, %c0_29, %c0_30] : memref<8x4x128xf32, #tpu.memory_space<vmem>>, vector<1x4x128xf32>
    %50 = vector.shape_cast %49 : vector<1x4x128xf32> to vector<4x128xf32>
    %cst_31 = arith.constant dense<0.000000e+00> : vector<128x128xf32>
    %51 = tpu.matmul %0, %50, %cst_31 {dimension_numbers = #tpu.dot_dimension_numbers<[1], [0], [0], [1], [0, 0, 1, 1], [], []>} : vector<128x4xf32>, vector<4x128xf32>, vector<128x128xf32> -> vector<128x128xf32>
    %52 = arith.addf %51, %2 : vector<128x128xf32>
    %53 = arith.index_cast %c5_i32 : i32 to index
    %c0_32 = arith.constant 0 : index
    %c0_33 = arith.constant 0 : index
    %54 = vector.load %arg6[%53, %c0_32, %c0_33] : memref<8x128x128xf32, #tpu.memory_space<vmem>>, vector<1x128x128xf32>
    %55 = vector.shape_cast %54 : vector<1x128x128xf32> to vector<128x128xf32>
    %56 = vector.shape_cast %52 : vector<128x128xf32> to vector<1x128x128xf32>
    tpu.vector_store %arg6[%53, %c0_32, %c0_33], %56 {strides = array<i32>} : memref<8x128x128xf32, #tpu.memory_space<vmem>>, vector<1x128x128xf32>,
    %c6_i32 = arith.constant 6 : i32
    %57 = arith.index_cast %c6_i32 : i32 to index
    %c0_34 = arith.constant 0 : index
    %c0_35 = arith.constant 0 : index
    %58 = vector.load %arg1[%57, %c0_34, %c0_35] : memref<8x4x128xf32, #tpu.memory_space<vmem>>, vector<1x4x128xf32>
    %59 = vector.shape_cast %58 : vector<1x4x128xf32> to vector<4x128xf32>
    %cst_36 = arith.constant dense<0.000000e+00> : vector<128x128xf32>
    %60 = tpu.matmul %0, %59, %cst_36 {dimension_numbers = #tpu.dot_dimension_numbers<[1], [0], [0], [1], [0, 0, 1, 1], [], []>} : vector<128x4xf32>, vector<4x128xf32>, vector<128x128xf32> -> vector<128x128xf32>
    %61 = arith.addf %60, %2 : vector<128x128xf32>
    %62 = arith.index_cast %c6_i32 : i32 to index
    %c0_37 = arith.constant 0 : index
    %c0_38 = arith.constant 0 : index
    %63 = vector.load %arg6[%62, %c0_37, %c0_38] : memref<8x128x128xf32, #tpu.memory_space<vmem>>, vector<1x128x128xf32>
    %64 = vector.shape_cast %63 : vector<1x128x128xf32> to vector<128x128xf32>
    %65 = vector.shape_cast %61 : vector<128x128xf32> to vector<1x128x128xf32>
    tpu.vector_store %arg6[%62, %c0_37, %c0_38], %65 {strides = array<i32>} : memref<8x128x128xf32, #tpu.memory_space<vmem>>, vector<1x128x128xf32>,
    %c7_i32 = arith.constant 7 : i32
    %66 = arith.index_cast %c7_i32 : i32 to index
    %c0_39 = arith.constant 0 : index
    %c0_40 = arith.constant 0 : index
    %67 = vector.load %arg1[%66, %c0_39, %c0_40] : memref<8x4x128xf32, #tpu.memory_space<vmem>>, vector<1x4x128xf32>
    %68 = vector.shape_cast %67 : vector<1x4x128xf32> to vector<4x128xf32>
    %cst_41 = arith.constant dense<0.000000e+00> : vector<128x128xf32>
    %69 = tpu.matmul %0, %68, %cst_41 {dimension_numbers = #tpu.dot_dimension_numbers<[1], [0], [0], [1], [0, 0, 1, 1], [], []>} : vector<128x4xf32>, vector<4x128xf32>, vector<128x128xf32> -> vector<128x128xf32>
    %70 = arith.addf %69, %2 : vector<128x128xf32>
    %71 = arith.index_cast %c7_i32 : i32 to index
    %c0_42 = arith.constant 0 : index
    %c0_43 = arith.constant 0 : index
    %72 = vector.load %arg6[%71, %c0_42, %c0_43] : memref<8x128x128xf32, #tpu.memory_space<vmem>>, vector<1x128x128xf32>
    %73 = vector.shape_cast %72 : vector<1x128x128xf32> to vector<128x128xf32>
    %74 = vector.shape_cast %70 : vector<128x128xf32> to vector<1x128x128xf32>
    tpu.vector_store %arg6[%71, %c0_42, %c0_43], %74 {strides = array<i32>} : memref<8x128x128xf32, #tpu.memory_space<vmem>>, vector<1x128x128xf32>,
    %c8_i32 = arith.constant 8 : i32
    %cst_44 = arith.constant 0.000000e+00 : f32
    %75 = vector.broadcast %cst_44 : f32 to vector<32x128xf32>
    %cst_45 = arith.constant 0.000000e+00 : f32
    %76 = vector.broadcast %cst_45 : f32 to vector<32x128xf32>
    %c0_i32_46 = arith.constant 0 : i32
    %77 = arith.index_cast %c0_i32_46 : i32 to index
    %c0_47 = arith.constant 0 : index
    %c0_48 = arith.constant 0 : index
    %78 = vector.load %arg6[%77, %c0_47, %c0_48] : memref<8x128x128xf32, #tpu.memory_space<vmem>>, vector<1x128x128xf32>
    %79 = vector.shape_cast %78 : vector<1x128x128xf32> to vector<128x128xf32>
    %cst_49 = arith.constant dense<0.000000e+00> : vector<128x128xf32>
    %80 = tpu.matmul %1, %75, %cst_49 {dimension_numbers = #tpu.dot_dimension_numbers<[1], [0], [0], [1], [0, 0, 1, 1], [], []>} : vector<128x32xf32>, vector<32x128xf32>, vector<128x128xf32> -> vector<128x128xf32>
    %81 = arith.addf %79, %80 : vector<128x128xf32>
    %82 = vector.extract_strided_slice %81 {offsets = [0, 0], sizes = [32, 128], strides = [1, 1]} : vector<128x128xf32> to vector<32x128xf32>
    %cst_50 = arith.constant 5.000000e-01 : f32
    %83 = vector.broadcast %cst_50 : f32 to vector<32x128xf32>
    %84 = arith.mulf %83, %82 : vector<32x128xf32>
    %85 = math.tanh %84 : vector<32x128xf32>
    %cst_51 = arith.constant 5.000000e-01 : f32
    %86 = vector.broadcast %cst_51 : f32 to vector<32x128xf32>
    %87 = arith.mulf %86, %85 : vector<32x128xf32>
    %cst_52 = arith.constant 5.000000e-01 : f32
    %88 = vector.broadcast %cst_52 : f32 to vector<32x128xf32>
    %89 = arith.addf %87, %88 : vector<32x128xf32>
    %90 = vector.extract_strided_slice %81 {offsets = [32, 0], sizes = [32, 128], strides = [1, 1]} : vector<128x128xf32> to vector<32x128xf32>
    %cst_53 = arith.constant 5.000000e-01 : f32
    %91 = vector.broadcast %cst_53 : f32 to vector<32x128xf32>
    %92 = arith.mulf %91, %90 : vector<32x128xf32>
    %93 = math.tanh %92 : vector<32x128xf32>
    %cst_54 = arith.constant 5.000000e-01 : f32
    %94 = vector.broadcast %cst_54 : f32 to vector<32x128xf32>
    %95 = arith.mulf %94, %93 : vector<32x128xf32>
    %cst_55 = arith.constant 5.000000e-01 : f32
    %96 = vector.broadcast %cst_55 : f32 to vector<32x128xf32>
    %97 = arith.addf %95, %96 : vector<32x128xf32>
    %98 = vector.extract_strided_slice %81 {offsets = [64, 0], sizes = [32, 128], strides = [1, 1]} : vector<128x128xf32> to vector<32x128xf32>
    %99 = math.tanh %98 : vector<32x128xf32>
    %100 = vector.extract_strided_slice %81 {offsets = [96, 0], sizes = [32, 128], strides = [1, 1]} : vector<128x128xf32> to vector<32x128xf32>
    %cst_56 = arith.constant 5.000000e-01 : f32
    %101 = vector.broadcast %cst_56 : f32 to vector<32x128xf32>
    %102 = arith.mulf %101, %100 : vector<32x128xf32>
    %103 = math.tanh %102 : vector<32x128xf32>
    %cst_57 = arith.constant 5.000000e-01 : f32
    %104 = vector.broadcast %cst_57 : f32 to vector<32x128xf32>
    %105 = arith.mulf %104, %103 : vector<32x128xf32>
    %cst_58 = arith.constant 5.000000e-01 : f32
    %106 = vector.broadcast %cst_58 : f32 to vector<32x128xf32>
    %107 = arith.addf %105, %106 : vector<32x128xf32>
    %108 = arith.mulf %97, %76 : vector<32x128xf32>
    %109 = arith.mulf %89, %99 : vector<32x128xf32>
    %110 = arith.addf %108, %109 : vector<32x128xf32>
    %111 = math.tanh %110 : vector<32x128xf32>
    %112 = arith.mulf %107, %111 : vector<32x128xf32>
    %c1_i32_59 = arith.constant 1 : i32
    %113 = arith.index_cast %c1_i32_59 : i32 to index
    %c0_60 = arith.constant 0 : index
    %c0_61 = arith.constant 0 : index
    %114 = vector.load %arg6[%113, %c0_60, %c0_61] : memref<8x128x128xf32, #tpu.memory_space<vmem>>, vector<1x128x128xf32>
    %115 = vector.shape_cast %114 : vector<1x128x128xf32> to vector<128x128xf32>
    %cst_62 = arith.constant dense<0.000000e+00> : vector<128x128xf32>
    %116 = tpu.matmul %1, %112, %cst_62 {dimension_numbers = #tpu.dot_dimension_numbers<[1], [0], [0], [1], [0, 0, 1, 1], [], []>} : vector<128x32xf32>, vector<32x128xf32>, vector<128x128xf32> -> vector<128x128xf32>
    %117 = arith.addf %115, %116 : vector<128x128xf32>
    %118 = vector.extract_strided_slice %117 {offsets = [0, 0], sizes = [32, 128], strides = [1, 1]} : vector<128x128xf32> to vector<32x128xf32>
    %cst_63 = arith.constant 5.000000e-01 : f32
    %119 = vector.broadcast %cst_63 : f32 to vector<32x128xf32>
    %120 = arith.mulf %119, %118 : vector<32x128xf32>
    %121 = math.tanh %120 : vector<32x128xf32>
    %cst_64 = arith.constant 5.000000e-01 : f32
    %122 = vector.broadcast %cst_64 : f32 to vector<32x128xf32>
    %123 = arith.mulf %122, %121 : vector<32x128xf32>
    %cst_65 = arith.constant 5.000000e-01 : f32
    %124 = vector.broadcast %cst_65 : f32 to vector<32x128xf32>
    %125 = arith.addf %123, %124 : vector<32x128xf32>
    %126 = vector.extract_strided_slice %117 {offsets = [32, 0], sizes = [32, 128], strides = [1, 1]} : vector<128x128xf32> to vector<32x128xf32>
    %cst_66 = arith.constant 5.000000e-01 : f32
    %127 = vector.broadcast %cst_66 : f32 to vector<32x128xf32>
    %128 = arith.mulf %127, %126 : vector<32x128xf32>
    %129 = math.tanh %128 : vector<32x128xf32>
    %cst_67 = arith.constant 5.000000e-01 : f32
    %130 = vector.broadcast %cst_67 : f32 to vector<32x128xf32>
    %131 = arith.mulf %130, %129 : vector<32x128xf32>
    %cst_68 = arith.constant 5.000000e-01 : f32
    %132 = vector.broadcast %cst_68 : f32 to vector<32x128xf32>
    %133 = arith.addf %131, %132 : vector<32x128xf32>
    %134 = vector.extract_strided_slice %117 {offsets = [64, 0], sizes = [32, 128], strides = [1, 1]} : vector<128x128xf32> to vector<32x128xf32>
    %135 = math.tanh %134 : vector<32x128xf32>
    %136 = vector.extract_strided_slice %117 {offsets = [96, 0], sizes = [32, 128], strides = [1, 1]} : vector<128x128xf32> to vector<32x128xf32>
    %cst_69 = arith.constant 5.000000e-01 : f32
    %137 = vector.broadcast %cst_69 : f32 to vector<32x128xf32>
    %138 = arith.mulf %137, %136 : vector<32x128xf32>
    %139 = math.tanh %138 : vector<32x128xf32>
    %cst_70 = arith.constant 5.000000e-01 : f32
    %140 = vector.broadcast %cst_70 : f32 to vector<32x128xf32>
    %141 = arith.mulf %140, %139 : vector<32x128xf32>
    %cst_71 = arith.constant 5.000000e-01 : f32
    %142 = vector.broadcast %cst_71 : f32 to vector<32x128xf32>
    %143 = arith.addf %141, %142 : vector<32x128xf32>
    %144 = arith.mulf %133, %110 : vector<32x128xf32>
    %145 = arith.mulf %125, %135 : vector<32x128xf32>
    %146 = arith.addf %144, %145 : vector<32x128xf32>
    %147 = math.tanh %146 : vector<32x128xf32>
    %148 = arith.mulf %143, %147 : vector<32x128xf32>
    %c2_i32_72 = arith.constant 2 : i32
    %149 = arith.index_cast %c2_i32_72 : i32 to index
    %c0_73 = arith.constant 0 : index
    %c0_74 = arith.constant 0 : index
    %150 = vector.load %arg6[%149, %c0_73, %c0_74] : memref<8x128x128xf32, #tpu.memory_space<vmem>>, vector<1x128x128xf32>
    %151 = vector.shape_cast %150 : vector<1x128x128xf32> to vector<128x128xf32>
    %cst_75 = arith.constant dense<0.000000e+00> : vector<128x128xf32>
    %152 = tpu.matmul %1, %148, %cst_75 {dimension_numbers = #tpu.dot_dimension_numbers<[1], [0], [0], [1], [0, 0, 1, 1], [], []>} : vector<128x32xf32>, vector<32x128xf32>, vector<128x128xf32> -> vector<128x128xf32>
    %153 = arith.addf %151, %152 : vector<128x128xf32>
    %154 = vector.extract_strided_slice %153 {offsets = [0, 0], sizes = [32, 128], strides = [1, 1]} : vector<128x128xf32> to vector<32x128xf32>
    %cst_76 = arith.constant 5.000000e-01 : f32
    %155 = vector.broadcast %cst_76 : f32 to vector<32x128xf32>
    %156 = arith.mulf %155, %154 : vector<32x128xf32>
    %157 = math.tanh %156 : vector<32x128xf32>
    %cst_77 = arith.constant 5.000000e-01 : f32
    %158 = vector.broadcast %cst_77 : f32 to vector<32x128xf32>
    %159 = arith.mulf %158, %157 : vector<32x128xf32>
    %cst_78 = arith.constant 5.000000e-01 : f32
    %160 = vector.broadcast %cst_78 : f32 to vector<32x128xf32>
    %161 = arith.addf %159, %160 : vector<32x128xf32>
    %162 = vector.extract_strided_slice %153 {offsets = [32, 0], sizes = [32, 128], strides = [1, 1]} : vector<128x128xf32> to vector<32x128xf32>
    %cst_79 = arith.constant 5.000000e-01 : f32
    %163 = vector.broadcast %cst_79 : f32 to vector<32x128xf32>
    %164 = arith.mulf %163, %162 : vector<32x128xf32>
    %165 = math.tanh %164 : vector<32x128xf32>
    %cst_80 = arith.constant 5.000000e-01 : f32
    %166 = vector.broadcast %cst_80 : f32 to vector<32x128xf32>
    %167 = arith.mulf %166, %165 : vector<32x128xf32>
    %cst_81 = arith.constant 5.000000e-01 : f32
    %168 = vector.broadcast %cst_81 : f32 to vector<32x128xf32>
    %169 = arith.addf %167, %168 : vector<32x128xf32>
    %170 = vector.extract_strided_slice %153 {offsets = [64, 0], sizes = [32, 128], strides = [1, 1]} : vector<128x128xf32> to vector<32x128xf32>
    %171 = math.tanh %170 : vector<32x128xf32>
    %172 = vector.extract_strided_slice %153 {offsets = [96, 0], sizes = [32, 128], strides = [1, 1]} : vector<128x128xf32> to vector<32x128xf32>
    %cst_82 = arith.constant 5.000000e-01 : f32
    %173 = vector.broadcast %cst_82 : f32 to vector<32x128xf32>
    %174 = arith.mulf %173, %172 : vector<32x128xf32>
    %175 = math.tanh %174 : vector<32x128xf32>
    %cst_83 = arith.constant 5.000000e-01 : f32
    %176 = vector.broadcast %cst_83 : f32 to vector<32x128xf32>
    %177 = arith.mulf %176, %175 : vector<32x128xf32>
    %cst_84 = arith.constant 5.000000e-01 : f32
    %178 = vector.broadcast %cst_84 : f32 to vector<32x128xf32>
    %179 = arith.addf %177, %178 : vector<32x128xf32>
    %180 = arith.mulf %169, %146 : vector<32x128xf32>
    %181 = arith.mulf %161, %171 : vector<32x128xf32>
    %182 = arith.addf %180, %181 : vector<32x128xf32>
    %183 = math.tanh %182 : vector<32x128xf32>
    %184 = arith.mulf %179, %183 : vector<32x128xf32>
    %c3_i32_85 = arith.constant 3 : i32
    %185 = arith.index_cast %c3_i32_85 : i32 to index
    %c0_86 = arith.constant 0 : index
    %c0_87 = arith.constant 0 : index
    %186 = vector.load %arg6[%185, %c0_86, %c0_87] : memref<8x128x128xf32, #tpu.memory_space<vmem>>, vector<1x128x128xf32>
    %187 = vector.shape_cast %186 : vector<1x128x128xf32> to vector<128x128xf32>
    %cst_88 = arith.constant dense<0.000000e+00> : vector<128x128xf32>
    %188 = tpu.matmul %1, %184, %cst_88 {dimension_numbers = #tpu.dot_dimension_numbers<[1], [0], [0], [1], [0, 0, 1, 1], [], []>} : vector<128x32xf32>, vector<32x128xf32>, vector<128x128xf32> -> vector<128x128xf32>
    %189 = arith.addf %187, %188 : vector<128x128xf32>
    %190 = vector.extract_strided_slice %189 {offsets = [0, 0], sizes = [32, 128], strides = [1, 1]} : vector<128x128xf32> to vector<32x128xf32>
    %cst_89 = arith.constant 5.000000e-01 : f32
    %191 = vector.broadcast %cst_89 : f32 to vector<32x128xf32>
    %192 = arith.mulf %191, %190 : vector<32x128xf32>
    %193 = math.tanh %192 : vector<32x128xf32>
    %cst_90 = arith.constant 5.000000e-01 : f32
    %194 = vector.broadcast %cst_90 : f32 to vector<32x128xf32>
    %195 = arith.mulf %194, %193 : vector<32x128xf32>
    %cst_91 = arith.constant 5.000000e-01 : f32
    %196 = vector.broadcast %cst_91 : f32 to vector<32x128xf32>
    %197 = arith.addf %195, %196 : vector<32x128xf32>
    %198 = vector.extract_strided_slice %189 {offsets = [32, 0], sizes = [32, 128], strides = [1, 1]} : vector<128x128xf32> to vector<32x128xf32>
    %cst_92 = arith.constant 5.000000e-01 : f32
    %199 = vector.broadcast %cst_92 : f32 to vector<32x128xf32>
    %200 = arith.mulf %199, %198 : vector<32x128xf32>
    %201 = math.tanh %200 : vector<32x128xf32>
    %cst_93 = arith.constant 5.000000e-01 : f32
    %202 = vector.broadcast %cst_93 : f32 to vector<32x128xf32>
    %203 = arith.mulf %202, %201 : vector<32x128xf32>
    %cst_94 = arith.constant 5.000000e-01 : f32
    %204 = vector.broadcast %cst_94 : f32 to vector<32x128xf32>
    %205 = arith.addf %203, %204 : vector<32x128xf32>
    %206 = vector.extract_strided_slice %189 {offsets = [64, 0], sizes = [32, 128], strides = [1, 1]} : vector<128x128xf32> to vector<32x128xf32>
    %207 = math.tanh %206 : vector<32x128xf32>
    %208 = vector.extract_strided_slice %189 {offsets = [96, 0], sizes = [32, 128], strides = [1, 1]} : vector<128x128xf32> to vector<32x128xf32>
    %cst_95 = arith.constant 5.000000e-01 : f32
    %209 = vector.broadcast %cst_95 : f32 to vector<32x128xf32>
    %210 = arith.mulf %209, %208 : vector<32x128xf32>
    %211 = math.tanh %210 : vector<32x128xf32>
    %cst_96 = arith.constant 5.000000e-01 : f32
    %212 = vector.broadcast %cst_96 : f32 to vector<32x128xf32>
    %213 = arith.mulf %212, %211 : vector<32x128xf32>
    %cst_97 = arith.constant 5.000000e-01 : f32
    %214 = vector.broadcast %cst_97 : f32 to vector<32x128xf32>
    %215 = arith.addf %213, %214 : vector<32x128xf32>
    %216 = arith.mulf %205, %182 : vector<32x128xf32>
    %217 = arith.mulf %197, %207 : vector<32x128xf32>
    %218 = arith.addf %216, %217 : vector<32x128xf32>
    %219 = math.tanh %218 : vector<32x128xf32>
    %220 = arith.mulf %215, %219 : vector<32x128xf32>
    %c4_i32_98 = arith.constant 4 : i32
    %221 = arith.index_cast %c4_i32_98 : i32 to index
    %c0_99 = arith.constant 0 : index
    %c0_100 = arith.constant 0 : index
    %222 = vector.load %arg6[%221, %c0_99, %c0_100] : memref<8x128x128xf32, #tpu.memory_space<vmem>>, vector<1x128x128xf32>
    %223 = vector.shape_cast %222 : vector<1x128x128xf32> to vector<128x128xf32>
    %cst_101 = arith.constant dense<0.000000e+00> : vector<128x128xf32>
    %224 = tpu.matmul %1, %220, %cst_101 {dimension_numbers = #tpu.dot_dimension_numbers<[1], [0], [0], [1], [0, 0, 1, 1], [], []>} : vector<128x32xf32>, vector<32x128xf32>, vector<128x128xf32> -> vector<128x128xf32>
    %225 = arith.addf %223, %224 : vector<128x128xf32>
    %226 = vector.extract_strided_slice %225 {offsets = [0, 0], sizes = [32, 128], strides = [1, 1]} : vector<128x128xf32> to vector<32x128xf32>
    %cst_102 = arith.constant 5.000000e-01 : f32
    %227 = vector.broadcast %cst_102 : f32 to vector<32x128xf32>
    %228 = arith.mulf %227, %226 : vector<32x128xf32>
    %229 = math.tanh %228 : vector<32x128xf32>
    %cst_103 = arith.constant 5.000000e-01 : f32
    %230 = vector.broadcast %cst_103 : f32 to vector<32x128xf32>
    %231 = arith.mulf %230, %229 : vector<32x128xf32>
    %cst_104 = arith.constant 5.000000e-01 : f32
    %232 = vector.broadcast %cst_104 : f32 to vector<32x128xf32>
    %233 = arith.addf %231, %232 : vector<32x128xf32>
    %234 = vector.extract_strided_slice %225 {offsets = [32, 0], sizes = [32, 128], strides = [1, 1]} : vector<128x128xf32> to vector<32x128xf32>
    %cst_105 = arith.constant 5.000000e-01 : f32
    %235 = vector.broadcast %cst_105 : f32 to vector<32x128xf32>
    %236 = arith.mulf %235, %234 : vector<32x128xf32>
    %237 = math.tanh %236 : vector<32x128xf32>
    %cst_106 = arith.constant 5.000000e-01 : f32
    %238 = vector.broadcast %cst_106 : f32 to vector<32x128xf32>
    %239 = arith.mulf %238, %237 : vector<32x128xf32>
    %cst_107 = arith.constant 5.000000e-01 : f32
    %240 = vector.broadcast %cst_107 : f32 to vector<32x128xf32>
    %241 = arith.addf %239, %240 : vector<32x128xf32>
    %242 = vector.extract_strided_slice %225 {offsets = [64, 0], sizes = [32, 128], strides = [1, 1]} : vector<128x128xf32> to vector<32x128xf32>
    %243 = math.tanh %242 : vector<32x128xf32>
    %244 = vector.extract_strided_slice %225 {offsets = [96, 0], sizes = [32, 128], strides = [1, 1]} : vector<128x128xf32> to vector<32x128xf32>
    %cst_108 = arith.constant 5.000000e-01 : f32
    %245 = vector.broadcast %cst_108 : f32 to vector<32x128xf32>
    %246 = arith.mulf %245, %244 : vector<32x128xf32>
    %247 = math.tanh %246 : vector<32x128xf32>
    %cst_109 = arith.constant 5.000000e-01 : f32
    %248 = vector.broadcast %cst_109 : f32 to vector<32x128xf32>
    %249 = arith.mulf %248, %247 : vector<32x128xf32>
    %cst_110 = arith.constant 5.000000e-01 : f32
    %250 = vector.broadcast %cst_110 : f32 to vector<32x128xf32>
    %251 = arith.addf %249, %250 : vector<32x128xf32>
    %252 = arith.mulf %241, %218 : vector<32x128xf32>
    %253 = arith.mulf %233, %243 : vector<32x128xf32>
    %254 = arith.addf %252, %253 : vector<32x128xf32>
    %255 = math.tanh %254 : vector<32x128xf32>
    %256 = arith.mulf %251, %255 : vector<32x128xf32>
    %c5_i32_111 = arith.constant 5 : i32
    %257 = arith.index_cast %c5_i32_111 : i32 to index
    %c0_112 = arith.constant 0 : index
    %c0_113 = arith.constant 0 : index
    %258 = vector.load %arg6[%257, %c0_112, %c0_113] : memref<8x128x128xf32, #tpu.memory_space<vmem>>, vector<1x128x128xf32>
    %259 = vector.shape_cast %258 : vector<1x128x128xf32> to vector<128x128xf32>
    %cst_114 = arith.constant dense<0.000000e+00> : vector<128x128xf32>
    %260 = tpu.matmul %1, %256, %cst_114 {dimension_numbers = #tpu.dot_dimension_numbers<[1], [0], [0], [1], [0, 0, 1, 1], [], []>} : vector<128x32xf32>, vector<32x128xf32>, vector<128x128xf32> -> vector<128x128xf32>
    %261 = arith.addf %259, %260 : vector<128x128xf32>
    %262 = vector.extract_strided_slice %261 {offsets = [0, 0], sizes = [32, 128], strides = [1, 1]} : vector<128x128xf32> to vector<32x128xf32>
    %cst_115 = arith.constant 5.000000e-01 : f32
    %263 = vector.broadcast %cst_115 : f32 to vector<32x128xf32>
    %264 = arith.mulf %263, %262 : vector<32x128xf32>
    %265 = math.tanh %264 : vector<32x128xf32>
    %cst_116 = arith.constant 5.000000e-01 : f32
    %266 = vector.broadcast %cst_116 : f32 to vector<32x128xf32>
    %267 = arith.mulf %266, %265 : vector<32x128xf32>
    %cst_117 = arith.constant 5.000000e-01 : f32
    %268 = vector.broadcast %cst_117 : f32 to vector<32x128xf32>
    %269 = arith.addf %267, %268 : vector<32x128xf32>
    %270 = vector.extract_strided_slice %261 {offsets = [32, 0], sizes = [32, 128], strides = [1, 1]} : vector<128x128xf32> to vector<32x128xf32>
    %cst_118 = arith.constant 5.000000e-01 : f32
    %271 = vector.broadcast %cst_118 : f32 to vector<32x128xf32>
    %272 = arith.mulf %271, %270 : vector<32x128xf32>
    %273 = math.tanh %272 : vector<32x128xf32>
    %cst_119 = arith.constant 5.000000e-01 : f32
    %274 = vector.broadcast %cst_119 : f32 to vector<32x128xf32>
    %275 = arith.mulf %274, %273 : vector<32x128xf32>
    %cst_120 = arith.constant 5.000000e-01 : f32
    %276 = vector.broadcast %cst_120 : f32 to vector<32x128xf32>
    %277 = arith.addf %275, %276 : vector<32x128xf32>
    %278 = vector.extract_strided_slice %261 {offsets = [64, 0], sizes = [32, 128], strides = [1, 1]} : vector<128x128xf32> to vector<32x128xf32>
    %279 = math.tanh %278 : vector<32x128xf32>
    %280 = vector.extract_strided_slice %261 {offsets = [96, 0], sizes = [32, 128], strides = [1, 1]} : vector<128x128xf32> to vector<32x128xf32>
    %cst_121 = arith.constant 5.000000e-01 : f32
    %281 = vector.broadcast %cst_121 : f32 to vector<32x128xf32>
    %282 = arith.mulf %281, %280 : vector<32x128xf32>
    %283 = math.tanh %282 : vector<32x128xf32>
    %cst_122 = arith.constant 5.000000e-01 : f32
    %284 = vector.broadcast %cst_122 : f32 to vector<32x128xf32>
    %285 = arith.mulf %284, %283 : vector<32x128xf32>
    %cst_123 = arith.constant 5.000000e-01 : f32
    %286 = vector.broadcast %cst_123 : f32 to vector<32x128xf32>
    %287 = arith.addf %285, %286 : vector<32x128xf32>
    %288 = arith.mulf %277, %254 : vector<32x128xf32>
    %289 = arith.mulf %269, %279 : vector<32x128xf32>
    %290 = arith.addf %288, %289 : vector<32x128xf32>
    %291 = math.tanh %290 : vector<32x128xf32>
    %292 = arith.mulf %287, %291 : vector<32x128xf32>
    %c6_i32_124 = arith.constant 6 : i32
    %293 = arith.index_cast %c6_i32_124 : i32 to index
    %c0_125 = arith.constant 0 : index
    %c0_126 = arith.constant 0 : index
    %294 = vector.load %arg6[%293, %c0_125, %c0_126] : memref<8x128x128xf32, #tpu.memory_space<vmem>>, vector<1x128x128xf32>
    %295 = vector.shape_cast %294 : vector<1x128x128xf32> to vector<128x128xf32>
    %cst_127 = arith.constant dense<0.000000e+00> : vector<128x128xf32>
    %296 = tpu.matmul %1, %292, %cst_127 {dimension_numbers = #tpu.dot_dimension_numbers<[1], [0], [0], [1], [0, 0, 1, 1], [], []>} : vector<128x32xf32>, vector<32x128xf32>, vector<128x128xf32> -> vector<128x128xf32>
    %297 = arith.addf %295, %296 : vector<128x128xf32>
    %298 = vector.extract_strided_slice %297 {offsets = [0, 0], sizes = [32, 128], strides = [1, 1]} : vector<128x128xf32> to vector<32x128xf32>
    %cst_128 = arith.constant 5.000000e-01 : f32
    %299 = vector.broadcast %cst_128 : f32 to vector<32x128xf32>
    %300 = arith.mulf %299, %298 : vector<32x128xf32>
    %301 = math.tanh %300 : vector<32x128xf32>
    %cst_129 = arith.constant 5.000000e-01 : f32
    %302 = vector.broadcast %cst_129 : f32 to vector<32x128xf32>
    %303 = arith.mulf %302, %301 : vector<32x128xf32>
    %cst_130 = arith.constant 5.000000e-01 : f32
    %304 = vector.broadcast %cst_130 : f32 to vector<32x128xf32>
    %305 = arith.addf %303, %304 : vector<32x128xf32>
    %306 = vector.extract_strided_slice %297 {offsets = [32, 0], sizes = [32, 128], strides = [1, 1]} : vector<128x128xf32> to vector<32x128xf32>
    %cst_131 = arith.constant 5.000000e-01 : f32
    %307 = vector.broadcast %cst_131 : f32 to vector<32x128xf32>
    %308 = arith.mulf %307, %306 : vector<32x128xf32>
    %309 = math.tanh %308 : vector<32x128xf32>
    %cst_132 = arith.constant 5.000000e-01 : f32
    %310 = vector.broadcast %cst_132 : f32 to vector<32x128xf32>
    %311 = arith.mulf %310, %309 : vector<32x128xf32>
    %cst_133 = arith.constant 5.000000e-01 : f32
    %312 = vector.broadcast %cst_133 : f32 to vector<32x128xf32>
    %313 = arith.addf %311, %312 : vector<32x128xf32>
    %314 = vector.extract_strided_slice %297 {offsets = [64, 0], sizes = [32, 128], strides = [1, 1]} : vector<128x128xf32> to vector<32x128xf32>
    %315 = math.tanh %314 : vector<32x128xf32>
    %316 = vector.extract_strided_slice %297 {offsets = [96, 0], sizes = [32, 128], strides = [1, 1]} : vector<128x128xf32> to vector<32x128xf32>
    %cst_134 = arith.constant 5.000000e-01 : f32
    %317 = vector.broadcast %cst_134 : f32 to vector<32x128xf32>
    %318 = arith.mulf %317, %316 : vector<32x128xf32>
    %319 = math.tanh %318 : vector<32x128xf32>
    %cst_135 = arith.constant 5.000000e-01 : f32
    %320 = vector.broadcast %cst_135 : f32 to vector<32x128xf32>
    %321 = arith.mulf %320, %319 : vector<32x128xf32>
    %cst_136 = arith.constant 5.000000e-01 : f32
    %322 = vector.broadcast %cst_136 : f32 to vector<32x128xf32>
    %323 = arith.addf %321, %322 : vector<32x128xf32>
    %324 = arith.mulf %313, %290 : vector<32x128xf32>
    %325 = arith.mulf %305, %315 : vector<32x128xf32>
    %326 = arith.addf %324, %325 : vector<32x128xf32>
    %327 = math.tanh %326 : vector<32x128xf32>
    %328 = arith.mulf %323, %327 : vector<32x128xf32>
    %c7_i32_137 = arith.constant 7 : i32
    %329 = arith.index_cast %c7_i32_137 : i32 to index
    %c0_138 = arith.constant 0 : index
    %c0_139 = arith.constant 0 : index
    %330 = vector.load %arg6[%329, %c0_138, %c0_139] : memref<8x128x128xf32, #tpu.memory_space<vmem>>, vector<1x128x128xf32>
    %331 = vector.shape_cast %330 : vector<1x128x128xf32> to vector<128x128xf32>
    %cst_140 = arith.constant dense<0.000000e+00> : vector<128x128xf32>
    %332 = tpu.matmul %1, %328, %cst_140 {dimension_numbers = #tpu.dot_dimension_numbers<[1], [0], [0], [1], [0, 0, 1, 1], [], []>} : vector<128x32xf32>, vector<32x128xf32>, vector<128x128xf32> -> vector<128x128xf32>
    %333 = arith.addf %331, %332 : vector<128x128xf32>
    %334 = vector.extract_strided_slice %333 {offsets = [0, 0], sizes = [32, 128], strides = [1, 1]} : vector<128x128xf32> to vector<32x128xf32>
    %cst_141 = arith.constant 5.000000e-01 : f32
    %335 = vector.broadcast %cst_141 : f32 to vector<32x128xf32>
    %336 = arith.mulf %335, %334 : vector<32x128xf32>
    %337 = math.tanh %336 : vector<32x128xf32>
    %cst_142 = arith.constant 5.000000e-01 : f32
    %338 = vector.broadcast %cst_142 : f32 to vector<32x128xf32>
    %339 = arith.mulf %338, %337 : vector<32x128xf32>
    %cst_143 = arith.constant 5.000000e-01 : f32
    %340 = vector.broadcast %cst_143 : f32 to vector<32x128xf32>
    %341 = arith.addf %339, %340 : vector<32x128xf32>
    %342 = vector.extract_strided_slice %333 {offsets = [32, 0], sizes = [32, 128], strides = [1, 1]} : vector<128x128xf32> to vector<32x128xf32>
    %cst_144 = arith.constant 5.000000e-01 : f32
    %343 = vector.broadcast %cst_144 : f32 to vector<32x128xf32>
    %344 = arith.mulf %343, %342 : vector<32x128xf32>
    %345 = math.tanh %344 : vector<32x128xf32>
    %cst_145 = arith.constant 5.000000e-01 : f32
    %346 = vector.broadcast %cst_145 : f32 to vector<32x128xf32>
    %347 = arith.mulf %346, %345 : vector<32x128xf32>
    %cst_146 = arith.constant 5.000000e-01 : f32
    %348 = vector.broadcast %cst_146 : f32 to vector<32x128xf32>
    %349 = arith.addf %347, %348 : vector<32x128xf32>
    %350 = vector.extract_strided_slice %333 {offsets = [64, 0], sizes = [32, 128], strides = [1, 1]} : vector<128x128xf32> to vector<32x128xf32>
    %351 = math.tanh %350 : vector<32x128xf32>
    %352 = vector.extract_strided_slice %333 {offsets = [96, 0], sizes = [32, 128], strides = [1, 1]} : vector<128x128xf32> to vector<32x128xf32>
    %cst_147 = arith.constant 5.000000e-01 : f32
    %353 = vector.broadcast %cst_147 : f32 to vector<32x128xf32>
    %354 = arith.mulf %353, %352 : vector<32x128xf32>
    %355 = math.tanh %354 : vector<32x128xf32>
    %cst_148 = arith.constant 5.000000e-01 : f32
    %356 = vector.broadcast %cst_148 : f32 to vector<32x128xf32>
    %357 = arith.mulf %356, %355 : vector<32x128xf32>
    %cst_149 = arith.constant 5.000000e-01 : f32
    %358 = vector.broadcast %cst_149 : f32 to vector<32x128xf32>
    %359 = arith.addf %357, %358 : vector<32x128xf32>
    %360 = arith.mulf %349, %326 : vector<32x128xf32>
    %361 = arith.mulf %341, %351 : vector<32x128xf32>
    %362 = arith.addf %360, %361 : vector<32x128xf32>
    %363 = math.tanh %362 : vector<32x128xf32>
    %364 = arith.mulf %359, %363 : vector<32x128xf32>
    %c8_i32_150 = arith.constant 8 : i32
    %c0_151 = arith.constant 0 : index
    %c0_152 = arith.constant 0 : index
    %365 = vector.load %arg5[%c0_151, %c0_152] : memref<32x128xf32, #tpu.memory_space<vmem>>, vector<32x128xf32>
    tpu.vector_store %arg5[%c0_151, %c0_152], %362 {strides = array<i32>} : memref<32x128xf32, #tpu.memory_space<vmem>>, vector<32x128xf32>,
    return
  }
  func.func @transform_0(%arg0: i32) -> (i32, i32, i32) {
    %c0_i32 = arith.constant 0 : i32
    %c0_i32_0 = arith.constant 0 : i32
    %c0_i32_1 = arith.constant 0 : i32
    return %c0_i32, %c0_i32_0, %arg0 : i32, i32, i32
  }
  func.func @transform_1(%arg0: i32) -> (i32, i32) {
    %c0_i32 = arith.constant 0 : i32
    %c0_i32_0 = arith.constant 0 : i32
    %c0_i32_1 = arith.constant 0 : i32
    return %c0_i32, %c0_i32_0 : i32, i32
  }
  func.func @transform_2(%arg0: i32) -> (i32, i32) {
    %c0_i32 = arith.constant 0 : i32
    %c0_i32_0 = arith.constant 0 : i32
    %c0_i32_1 = arith.constant 0 : i32
    return %c0_i32, %c0_i32_0 : i32, i32
  }
  func.func @transform_3(%arg0: i32) -> (i32, i32) {
    %c0_i32 = arith.constant 0 : i32
    %c0_i32_0 = arith.constant 0 : i32
    %c0_i32_1 = arith.constant 0 : i32
    return %c0_i32, %c0_i32_0 : i32, i32
  }
  func.func @transform_4(%arg0: i32) -> (i32, i32) {
    %c0_i32 = arith.constant 0 : i32
    %c0_i32_0 = arith.constant 0 : i32
    return %c0_i32, %arg0 : i32, i32
  }
}

</mosaic_0001>

<bundles_post_ra>
// kernel: tpu_custom_call.1
= control target key start
LH: loop header
LB: loop body
LE: loop exit
PB: predicated region body
PF: predicated region fallthrough
CT: control target
= control target key end

     0   :  { %vm116_vm0 = vcmask 1043456   ;;  %vm67_vm1 = vcmask 31744   ;;  %s6394_s0 = inlined_call_operand.vmem [shape: f32[8,4,128], index: 0, kind: input, shape index: {}]   ;;  %s6395_s1 = inlined_call_operand.vmem [shape: f32[128,4], index: 1, kind: input, shape index: {}]   ;;  %s6396_s2 = inlined_call_operand.vmem [shape: f32[128,32], index: 2, kind: input, shape index: {}]   ;;  %s6397_s3 = inlined_call_operand.vmem [shape: f32[128,128], index: 3, kind: input, shape index: {}]   ;;  %s6398_s4 = inlined_call_operand.hbm [shape: f32[32,128], index: 4, kind: output, shape index: {}]  }
   0x1   :  { %v66_v0 = vld [vmem:[%s6394_s0] sm:$0xf]  ;;  %v5205_v2 = vld [vmem:[%s6395_s1 + $0x8] sm:$0xff]  ;;  %v5213_v3 = vld [vmem:[%s6395_s1 + $0x10] sm:$0xff] }
   0x2   :  { %v5200_v1 = vld [vmem:[%s6395_s1] sm:$0xff]  ;;  %4039 = vmatprep.subr.msk.mxu0 %vm116_vm0, %v66_v0  ;;  %v5225_v4 = vld [vmem:[%s6395_s1 + $0x18] sm:$0xff]  ;;  %v3510_v6 = vld [vmem:[%s6394_s0 + $0x8] sm:$0xf] }
   0x3   :  { %4041 = vmatprep.mubr.msk.f32.mxu0 %vm67_vm1, %v5200_v1  ;;  %4040 = vmatpush3.msk.msra.mxu0 %vm116_vm0, %v66_v0  ;;  %v5230_v5 = vld [vmem:[%s6395_s1 + $0x20] sm:$0xff]  ;;  %v3546_v7 = vld [vmem:[%s6394_s0 + $0x10] sm:$0xf]  ;;  %v5246_v8 = vld [vmem:[%s6395_s1 + $0x28] sm:$0xff] }
   0x4   :  { %4067 = vmatprep.mubr.msk.f32.mxu1 %vm67_vm1, %v5200_v1  ;;  %4042 = vmatmul.mubr.msk.f32.vlgmr.msra.gmra.mrb[0].mxu0 %vm67_vm1, %v5205_v2 }
   0x5   :  { %4044 = vmatprep.mubr.msk.f32.mxu0 %vm67_vm1, %v5213_v3  ;;  %4091 = vmatprep.subr.msk.mxu0 %vm116_vm0, %v3510_v6 }
   0x6   :  { %4092 = vmatpush3.msk.msra.mxu0 %vm116_vm0, %v3510_v6 }
   0x8   :  { %4045 = vmatmul.mubr.msk.f32.gmra.mrb[2].mxu0 %vm67_vm1, %v5225_v4 }
   0x9   :  { %4047 = vmatprep.mubr.msk.f32.mxu0 %vm67_vm1, %v5230_v5 }
   0xa   :  { %9 = vsyncpa [#allocation4], 0  ;;  %v5252_v9 = vld [vmem:[%s6395_s1 + $0x30] sm:$0xff]  ;;  %4143 = vmatprep.subr.msk.mxu0 %vm116_vm0, %v3546_v7  ;;  %v5262_v10 = vld [vmem:[%s6395_s1 + $0x38] sm:$0xff]  ;;  %v5165_v23 = vmov 0.0   ;;  %vm1466_vm2 = vcmask 261120  }
   0xb   :  { %v5267_v11 = vld [vmem:[%s6395_s1 + $0x40] sm:$0xff]  ;;  %v5276_v12 = vld [vmem:[%s6395_s1 + $0x48] sm:$0xff]  ;;  %v5281_v13 = vld [vmem:[%s6395_s1 + $0x50] sm:$0xff] }
   0xc   :  { %4048 = vmatmul.mubr.msk.f32.gmra.mrb[4].mxu0 %vm67_vm1, %v5246_v8  ;;  %v5290_v14 = vld [vmem:[%s6395_s1 + $0x58] sm:$0xff]  ;;  %v5295_v15 = vld [vmem:[%s6395_s1 + $0x60] sm:$0xff]  ;;  %v5304_v16 = vld [vmem:[%s6395_s1 + $0x68] sm:$0xff] }
   0xd   :  { %4050 = vmatprep.mubr.msk.f32.mxu0 %vm67_vm1, %v5252_v9  ;;  %v5309_v17 = vld [vmem:[%s6395_s1 + $0x70] sm:$0xff]  ;;  %v5318_v18 = vld [vmem:[%s6395_s1 + $0x78] sm:$0xff]  ;;  %v3492_v19 = vld [vmem:[%s6394_s0 + $0x4] sm:$0xf] }
   0xe   :  { %v3528_v20 = vld [vmem:[%s6394_s0 + $0xc] sm:$0xf]  ;;  %4065 = vmatprep.subr.msk.mxu1 %vm116_vm0, %v3492_v19  ;;  %v3582_v21 = vld [vmem:[%s6394_s0 + $0x18] sm:$0xf]  ;;  %v3564_v22 = vld [vmem:[%s6394_s0 + $0x14] sm:$0xf] }
   0xf   :  { %4066 = vmatpush3.msk.msra.mxu1 %vm116_vm0, %v3492_v19  ;;  %v5532_v24 = vld [vmem:[%s6396_s2] sm:$0xff]  ;;  %v5545_v25 = vld [vmem:[%s6396_s2 + $0x8] sm:$0xff]  ;;  %v5550_v26 = vld [vmem:[%s6396_s2 + $0x10] sm:$0xff] }
  0x10   :  { %4051 = vmatmul.mubr.msk.f32.gmra.mrb[6].mxu0 %vm67_vm1, %v5262_v10  ;;  %4068 = vmatmul.mubr.msk.f32.vlgmr.msra.gmra.mrb[0].mxu1 %vm67_vm1, %v5205_v2  ;;  %v5559_v27 = vld [vmem:[%s6396_s2 + $0x18] sm:$0xff]  ;;  %v5564_v28 = vld [vmem:[%s6396_s2 + $0x20] sm:$0xff]  ;;  %v5573_v29 = vld [vmem:[%s6396_s2 + $0x28] sm:$0xff] }
  0x11   :  { %4053 = vmatprep.mubr.msk.f32.mxu0 %vm67_vm1, %v5267_v11  ;;  %4117 = vmatprep.subr.msk.mxu1 %vm116_vm0, %v3528_v20  ;;  %v5578_v30 = vld [vmem:[%s6396_s2 + $0x30] sm:$0xff]  ;;  %v5587_v31 = vld [vmem:[%s6396_s2 + $0x38] sm:$0xff]  ;;  %v5592_v32 = vld [vmem:[%s6396_s2 + $0x40] sm:$0xff] }
  0x12   :  { %4070 = vmatprep.mubr.msk.f32.mxu1 %vm67_vm1, %v5213_v3  ;;  %4118 = vmatpush3.msk.msra.mxu1 %vm116_vm0, %v3528_v20  ;;  %v5601_v33 = vld [vmem:[%s6396_s2 + $0x48] sm:$0xff]  ;;  %v5606_v34 = vld [vmem:[%s6396_s2 + $0x50] sm:$0xff]  ;;  %v5615_v35 = vld [vmem:[%s6396_s2 + $0x58] sm:$0xff] }
  0x13   :  { %4169 = vmatprep.subr.msk.mxu1 %vm116_vm0, %v3564_v22  ;;  %v5620_v36 = vld [vmem:[%s6396_s2 + $0x60] sm:$0xff]  ;;  %v5629_v37 = vld [vmem:[%s6396_s2 + $0x68] sm:$0xff]  ;;  %v5634_v38 = vld [vmem:[%s6396_s2 + $0x70] sm:$0xff] }
  0x14   :  { %4054 = vmatmul.mubr.msk.f32.gmra.mrb[8].mxu0 %vm67_vm1, %v5276_v12  ;;  %4071 = vmatmul.mubr.msk.f32.gmra.mrb[2].mxu1 %vm67_vm1, %v5225_v4  ;;  %v5643_v39 = vld [vmem:[%s6396_s2 + $0x78] sm:$0xff]  ;;  %v5689_v41 = vld [vmem:[%s6397_s3 + $0x8] sm:$0xff]  ;;  %v5694_v42 = vld [vmem:[%s6397_s3] sm:$0xff] }
  0x15   :  { %4056 = vmatprep.mubr.msk.f32.mxu0 %vm67_vm1, %v5281_v13  ;;  %4073 = vmatprep.mubr.msk.f32.mxu1 %vm67_vm1, %v5230_v5  ;;  %v3600_v40 = vld [vmem:[%s6394_s0 + $0x1c] sm:$0xf]  ;;  %v5706_v49 = vld [vmem:[%s6397_s3 + $0x10] sm:$0xff]  ;;  %v5712_v54 = vld [vmem:[%s6397_s3 + $0x28] sm:$0xff] }
  0x16   :  { %v5701_v47 = vld [vmem:[%s6397_s3 + $0x18] sm:$0xff]  ;;  %v5718_v56 = vld [vmem:[%s6397_s3 + $0x20] sm:$0xff] }
  0x17   :  { %v5725_v62 = vld [vmem:[%s6397_s3 + $0x38] sm:$0xff] }
  0x18   :  { %4057 = vmatmul.mubr.msk.f32.gmra.mrb[10].mxu0 %vm67_vm1, %v5290_v14  ;;  %4074 = vmatmul.mubr.msk.f32.gmra.mrb[4].mxu1 %vm67_vm1, %v5246_v8 }
  0x19   :  { %4059 = vmatprep.mubr.msk.f32.mxu0 %vm67_vm1, %v5295_v15  ;;  %4076 = vmatprep.mubr.msk.f32.mxu1 %vm67_vm1, %v5252_v9 }
  0x1c   :  { %4060 = vmatmul.mubr.msk.f32.gmra.mrb[12].mxu0 %vm67_vm1, %v5304_v16  ;;  %4077 = vmatmul.mubr.msk.f32.gmra.mrb[6].mxu1 %vm67_vm1, %v5262_v10 }
  0x1d   :  { %4062 = vmatprep.mubr.msk.f32.mxu0 %vm67_vm1, %v5309_v17  ;;  %4079 = vmatprep.mubr.msk.f32.mxu1 %vm67_vm1, %v5267_v11 }
  0x20   :  { %4063 = vmatmul.mubr.msk.f32.gmra.mrb[14].mxu0 %vm67_vm1, %v5318_v18  ;;  %4080 = vmatmul.mubr.msk.f32.gmra.mrb[8].mxu1 %vm67_vm1, %v5276_v12 }
  0x21   :  { %4093 = vmatprep.mubr.msk.f32.mxu0 %vm67_vm1, %v5200_v1  ;;  %4082 = vmatprep.mubr.msk.f32.mxu1 %vm67_vm1, %v5281_v13 }
  0x24   :  { %4094 = vmatmul.mubr.msk.f32.vlgmr.msra.gmra.mrb[16].mxu0 %vm67_vm1, %v5205_v2  ;;  %4083 = vmatmul.mubr.msk.f32.gmra.mrb[10].mxu1 %vm67_vm1, %v5290_v14 }
  0x25   :  { %4096 = vmatprep.mubr.msk.f32.mxu0 %vm67_vm1, %v5213_v3  ;;  %4144 = vmatpush3.msk.msra.mxu0 %vm116_vm0, %v3546_v7  ;;  %v5737_v7 = vld [vmem:[%s6397_s3 + $0x48] sm:$0xff] }
  0x26   :  { %4195 = vmatprep.subr.msk.mxu0 %vm116_vm0, %v3582_v21  ;;  %4085 = vmatprep.mubr.msk.f32.mxu1 %vm67_vm1, %v5295_v15 }
  0x28   :  { %4097 = vmatmul.mubr.msk.f32.gmra.mrb[18].mxu0 %vm67_vm1, %v5225_v4  ;;  %4086 = vmatmul.mubr.msk.f32.gmra.mrb[12].mxu1 %vm67_vm1, %v5304_v16 }
  0x29   :  { %4099 = vmatprep.mubr.msk.f32.mxu0 %vm67_vm1, %v5230_v5  ;;  %4088 = vmatprep.mubr.msk.f32.mxu1 %vm67_vm1, %v5309_v17 }
  0x2c   :  { %4100 = vmatmul.mubr.msk.f32.gmra.mrb[20].mxu0 %vm67_vm1, %v5246_v8  ;;  %4089 = vmatmul.mubr.msk.f32.gmra.mrb[14].mxu1 %vm67_vm1, %v5318_v18 }
  0x2d   :  { %4102 = vmatprep.mubr.msk.f32.mxu0 %vm67_vm1, %v5252_v9  ;;  %4119 = vmatprep.mubr.msk.f32.mxu1 %vm67_vm1, %v5200_v1 }
  0x30   :  { %4103 = vmatmul.mubr.msk.f32.gmra.mrb[22].mxu0 %vm67_vm1, %v5262_v10  ;;  %4120 = vmatmul.mubr.msk.f32.vlgmr.msra.gmra.mrb[16].mxu1 %vm67_vm1, %v5205_v2 }
  0x31   :  { %4105 = vmatprep.mubr.msk.f32.mxu0 %vm67_vm1, %v5267_v11  ;;  %4122 = vmatprep.mubr.msk.f32.mxu1 %vm67_vm1, %v5213_v3 }
  0x32   :  { %4170 = vmatpush3.msk.msra.mxu1 %vm116_vm0, %v3564_v22 }
  0x33   :  { %4221 = vmatprep.subr.msk.mxu1 %vm116_vm0, %v3600_v40 }
  0x34   :  { %4106 = vmatmul.mubr.msk.f32.gmra.mrb[24].mxu0 %vm67_vm1, %v5276_v12  ;;  %4123 = vmatmul.mubr.msk.f32.gmra.mrb[18].mxu1 %vm67_vm1, %v5225_v4 }
  0x35   :  { %4108 = vmatprep.mubr.msk.f32.mxu0 %vm67_vm1, %v5281_v13  ;;  %4125 = vmatprep.mubr.msk.f32.mxu1 %vm67_vm1, %v5230_v5 }
  0x38   :  { %4109 = vmatmul.mubr.msk.f32.gmra.mrb[26].mxu0 %vm67_vm1, %v5290_v14  ;;  %4126 = vmatmul.mubr.msk.f32.gmra.mrb[20].mxu1 %vm67_vm1, %v5246_v8 }
  0x39   :  { %4111 = vmatprep.mubr.msk.f32.mxu0 %vm67_vm1, %v5295_v15  ;;  %4128 = vmatprep.mubr.msk.f32.mxu1 %vm67_vm1, %v5252_v9 }
  0x3c   :  { %4112 = vmatmul.mubr.msk.f32.gmra.mrb[28].mxu0 %vm67_vm1, %v5304_v16  ;;  %4129 = vmatmul.mubr.msk.f32.gmra.mrb[22].mxu1 %vm67_vm1, %v5262_v10 }
  0x3d   :  { %4114 = vmatprep.mubr.msk.f32.mxu0 %vm67_vm1, %v5309_v17  ;;  %4131 = vmatprep.mubr.msk.f32.mxu1 %vm67_vm1, %v5267_v11 }
  0x40   :  { %4115 = vmatmul.mubr.msk.f32.gmra.mrb[30].mxu0 %vm67_vm1, %v5318_v18  ;;  %4132 = vmatmul.mubr.msk.f32.gmra.mrb[24].mxu1 %vm67_vm1, %v5276_v12 }
  0x41   :  { %4145 = vmatprep.mubr.msk.f32.mxu0 %vm67_vm1, %v5200_v1  ;;  %4134 = vmatprep.mubr.msk.f32.mxu1 %vm67_vm1, %v5281_v13 }
  0x44   :  { %4146 = vmatmul.mubr.msk.f32.vlgmr.msra.gmra.mrb[32].mxu0 %vm67_vm1, %v5205_v2  ;;  %4135 = vmatmul.mubr.msk.f32.gmra.mrb[26].mxu1 %vm67_vm1, %v5290_v14 }
  0x45   :  { %4148 = vmatprep.mubr.msk.f32.mxu0 %vm67_vm1, %v5213_v3  ;;  %4196 = vmatpush3.msk.msra.mxu0 %vm116_vm0, %v3582_v21 }
  0x46   :  { %4247 = vmatprep.subr.mxu0 %v5165_v23  ;;  %4137 = vmatprep.mubr.msk.f32.mxu1 %vm67_vm1, %v5295_v15 }
  0x48   :  { %4149 = vmatmul.mubr.msk.f32.gmra.mrb[34].mxu0 %vm67_vm1, %v5225_v4  ;;  %4138 = vmatmul.mubr.msk.f32.gmra.mrb[28].mxu1 %vm67_vm1, %v5304_v16 }
  0x49   :  { %4151 = vmatprep.mubr.msk.f32.mxu0 %vm67_vm1, %v5230_v5  ;;  %4140 = vmatprep.mubr.msk.f32.mxu1 %vm67_vm1, %v5309_v17 }
  0x4c   :  { %4152 = vmatmul.mubr.msk.f32.gmra.mrb[36].mxu0 %vm67_vm1, %v5246_v8  ;;  %4141 = vmatmul.mubr.msk.f32.gmra.mrb[30].mxu1 %vm67_vm1, %v5318_v18 }
  0x4d   :  { %4154 = vmatprep.mubr.msk.f32.mxu0 %vm67_vm1, %v5252_v9  ;;  %4171 = vmatprep.mubr.msk.f32.mxu1 %vm67_vm1, %v5200_v1 }
  0x50   :  { %4155 = vmatmul.mubr.msk.f32.gmra.mrb[38].mxu0 %vm67_vm1, %v5262_v10  ;;  %4172 = vmatmul.mubr.msk.f32.vlgmr.msra.gmra.mrb[32].mxu1 %vm67_vm1, %v5205_v2 }
  0x51   :  { %4157 = vmatprep.mubr.msk.f32.mxu0 %vm67_vm1, %v5267_v11  ;;  %4174 = vmatprep.mubr.msk.f32.mxu1 %vm67_vm1, %v5213_v3 }
  0x52   :  { %4222 = vmatpush3.msk.msra.mxu1 %vm116_vm0, %v3600_v40  ;;  %v5761_v40 = vld [vmem:[%s6397_s3 + $0x68] sm:$0xff] }
  0x54   :  { %4158 = vmatmul.mubr.msk.f32.gmra.mrb[40].mxu0 %vm67_vm1, %v5276_v12  ;;  %4175 = vmatmul.mubr.msk.f32.gmra.mrb[34].mxu1 %vm67_vm1, %v5225_v4 }
  0x55   :  { %4160 = vmatprep.mubr.msk.f32.mxu0 %vm67_vm1, %v5281_v13  ;;  %4177 = vmatprep.mubr.msk.f32.mxu1 %vm67_vm1, %v5230_v5 }
  0x58   :  { %4161 = vmatmul.mubr.msk.f32.gmra.mrb[42].mxu0 %vm67_vm1, %v5290_v14  ;;  %4178 = vmatmul.mubr.msk.f32.gmra.mrb[36].mxu1 %vm67_vm1, %v5246_v8 }
  0x59   :  { %4163 = vmatprep.mubr.msk.f32.mxu0 %vm67_vm1, %v5295_v15  ;;  %4180 = vmatprep.mubr.msk.f32.mxu1 %vm67_vm1, %v5252_v9 }
  0x5c   :  { %4164 = vmatmul.mubr.msk.f32.gmra.mrb[44].mxu0 %vm67_vm1, %v5304_v16  ;;  %4181 = vmatmul.mubr.msk.f32.gmra.mrb[38].mxu1 %vm67_vm1, %v5262_v10 }
  0x5d   :  { %4166 = vmatprep.mubr.msk.f32.mxu0 %vm67_vm1, %v5309_v17  ;;  %4183 = vmatprep.mubr.msk.f32.mxu1 %vm67_vm1, %v5267_v11 }
  0x60   :  { %4167 = vmatmul.mubr.msk.f32.gmra.mrb[46].mxu0 %vm67_vm1, %v5318_v18  ;;  %4184 = vmatmul.mubr.msk.f32.gmra.mrb[40].mxu1 %vm67_vm1, %v5276_v12 }
  0x61   :  { %4197 = vmatprep.mubr.msk.f32.mxu0 %vm67_vm1, %v5200_v1  ;;  %4186 = vmatprep.mubr.msk.f32.mxu1 %vm67_vm1, %v5281_v13 }
  0x64   :  { %4198 = vmatmul.mubr.msk.f32.vlgmr.msra.gmra.mrb[48].mxu0 %vm67_vm1, %v5205_v2  ;;  %4187 = vmatmul.mubr.msk.f32.gmra.mrb[42].mxu1 %vm67_vm1, %v5290_v14 }
  0x65   :  { %4200 = vmatprep.mubr.msk.f32.mxu0 %vm67_vm1, %v5213_v3  ;;  %4248 = vmatpush3.msra.mxu0 %v5165_v23 }
  0x66   :  { %4189 = vmatprep.mubr.msk.f32.mxu1 %vm67_vm1, %v5295_v15 }
  0x68   :  { %4201 = vmatmul.mubr.msk.f32.gmra.mrb[50].mxu0 %vm67_vm1, %v5225_v4  ;;  %4190 = vmatmul.mubr.msk.f32.gmra.mrb[44].mxu1 %vm67_vm1, %v5304_v16 }
  0x69   :  { %4203 = vmatprep.mubr.msk.f32.mxu0 %vm67_vm1, %v5230_v5  ;;  %4192 = vmatprep.mubr.msk.f32.mxu1 %vm67_vm1, %v5309_v17 }
  0x6c   :  { %4204 = vmatmul.mubr.msk.f32.gmra.mrb[52].mxu0 %vm67_vm1, %v5246_v8  ;;  %4193 = vmatmul.mubr.msk.f32.gmra.mrb[46].mxu1 %vm67_vm1, %v5318_v18 }
  0x6d   :  { %4206 = vmatprep.mubr.msk.f32.mxu0 %vm67_vm1, %v5252_v9  ;;  %4223 = vmatprep.mubr.msk.f32.mxu1 %vm67_vm1, %v5200_v1  ;;  %v5730_v1 = vld [vmem:[%s6397_s3 + $0x30] sm:$0xff] }
  0x70   :  { %4207 = vmatmul.mubr.msk.f32.gmra.mrb[54].mxu0 %vm67_vm1, %v5262_v10  ;;  %4224 = vmatmul.mubr.msk.f32.vlgmr.msra.gmra.mrb[48].mxu1 %vm67_vm1, %v5205_v2 }
  0x71   :  { %4209 = vmatprep.mubr.msk.f32.mxu0 %vm67_vm1, %v5267_v11  ;;  %4226 = vmatprep.mubr.msk.f32.mxu1 %vm67_vm1, %v5213_v3 }
  0x74   :  { %4210 = vmatmul.mubr.msk.f32.gmra.mrb[56].mxu0 %vm67_vm1, %v5276_v12  ;;  %4227 = vmatmul.mubr.msk.f32.gmra.mrb[50].mxu1 %vm67_vm1, %v5225_v4 }
  0x75   :  { %4212 = vmatprep.mubr.msk.f32.mxu0 %vm67_vm1, %v5281_v13  ;;  %4229 = vmatprep.mubr.msk.f32.mxu1 %vm67_vm1, %v5230_v5 }
  0x78   :  { %4213 = vmatmul.mubr.msk.f32.gmra.mrb[58].mxu0 %vm67_vm1, %v5290_v14  ;;  %4230 = vmatmul.mubr.msk.f32.gmra.mrb[52].mxu1 %vm67_vm1, %v5246_v8 }
  0x79   :  { %4215 = vmatprep.mubr.msk.f32.mxu0 %vm67_vm1, %v5295_v15  ;;  %4232 = vmatprep.mubr.msk.f32.mxu1 %vm67_vm1, %v5252_v9  ;;  %v5742_v9 = vld [vmem:[%s6397_s3 + $0x40] sm:$0xff] }
  0x7c   :  { %4216 = vmatmul.mubr.msk.f32.gmra.mrb[60].mxu0 %vm67_vm1, %v5304_v16  ;;  %4233 = vmatmul.mubr.msk.f32.gmra.mrb[54].mxu1 %vm67_vm1, %v5262_v10 }
  0x7d   :  { %4218 = vmatprep.mubr.msk.f32.mxu0 %vm67_vm1, %v5309_v17  ;;  %4235 = vmatprep.mubr.msk.f32.mxu1 %vm67_vm1, %v5267_v11 }
  0x80   :  { %4219 = vmatmul.mubr.msk.f32.gmra.mrb[62].mxu0 %vm67_vm1, %v5318_v18  ;;  %4236 = vmatmul.mubr.msk.f32.gmra.mrb[56].mxu1 %vm67_vm1, %v5276_v12 }
  0x81   :  { %4249 = vmatprep.mubr.msk.f32.mxu0 %vm1466_vm2, %v5532_v24  ;;  %4238 = vmatprep.mubr.msk.f32.mxu1 %vm67_vm1, %v5281_v13 }
  0x84   :  { %4250 = vmatmul.mubr.msk.f32.vlgmr.msra.gmra.mrb[0].mxu0 %vm1466_vm2, %v5545_v25  ;;  %4239 = vmatmul.mubr.msk.f32.gmra.mrb[58].mxu1 %vm67_vm1, %v5290_v14 }
  0x85   :  { %4252 = vmatprep.mubr.msk.f32.mxu0 %vm1466_vm2, %v5550_v26  ;;  %4241 = vmatprep.mubr.msk.f32.mxu1 %vm67_vm1, %v5295_v15  ;;  %v5749_v15 = vld [vmem:[%s6397_s3 + $0x58] sm:$0xff] }
  0x88   :  { %4253 = vmatmul.mubr.msk.f32.gmra.mrb[2].mxu0 %vm1466_vm2, %v5559_v27  ;;  %4242 = vmatmul.mubr.msk.f32.gmra.mrb[60].mxu1 %vm67_vm1, %v5304_v16 }
  0x89   :  { %4255 = vmatprep.mubr.msk.f32.mxu0 %vm1466_vm2, %v5564_v28  ;;  %4244 = vmatprep.mubr.msk.f32.mxu1 %vm67_vm1, %v5309_v17  ;;  %v5754_v17 = vld [vmem:[%s6397_s3 + $0x50] sm:$0xff] }
  0x8c   :  { %4256 = vmatmul.mubr.msk.f32.gmra.mrb[4].mxu0 %vm1466_vm2, %v5573_v29  ;;  %4245 = vmatmul.mubr.msk.f32.gmra.mrb[62].mxu1 %vm67_vm1, %v5318_v18 }
  0x8d   :  { %4258 = vmatprep.mubr.msk.f32.mxu0 %vm1466_vm2, %v5578_v30  ;;  %4281 = vmatprep.mubr.msk.f32.mxu1 %vm1466_vm2, %v5532_v24 }
  0x90   :  { %4259 = vmatmul.mubr.msk.f32.gmra.mrb[6].mxu0 %vm1466_vm2, %v5587_v31 }
  0x91   :  { %4261 = vmatprep.mubr.msk.f32.mxu0 %vm1466_vm2, %v5592_v32 }
  0x94   :  { %4262 = vmatmul.mubr.msk.f32.gmra.mrb[8].mxu0 %vm1466_vm2, %v5601_v33 }
  0x95   :  { %4264 = vmatprep.mubr.msk.f32.mxu0 %vm1466_vm2, %v5606_v34 }
  0x98   :  { %4265 = vmatmul.mubr.msk.f32.gmra.mrb[10].mxu0 %vm1466_vm2, %v5615_v35 }
  0x99   :  { %4267 = vmatprep.mubr.msk.f32.mxu0 %vm1466_vm2, %v5620_v36 }
  0x9c   :  { %4268 = vmatmul.mubr.msk.f32.gmra.mrb[12].mxu0 %vm1466_vm2, %v5629_v37 }
  0x9d   :  { %4270 = vmatprep.mubr.msk.f32.mxu0 %vm1466_vm2, %v5634_v38 }
  0xa0   :  { %4271 = vmatmul.mubr.msk.f32.gmra.mrb[14].mxu0 %vm1466_vm2, %v5643_v39 }
  0xa1   :  { %4313 = vmatprep.mubr.msk.f32.mxu0 %vm1466_vm2, %v5532_v24 }
 0x157   :  { %v4251_v43 = vpop.f32.mrb[0].mxu0 }
 0x158   :  { %v4553_v44 = vadd.f32 %v4251_v43, %v5689_v41  ;;  %v1581_v45 = vpop.f32.mrb[1].mxu0 }
 0x159   :  { %v4554_v46 = vadd.f32 %v1581_v45, %v5694_v42 }
 0x15a   :  { %v1677_v50 = vmul.f32 0.5, %v4553_v44 }
 0x15b   :  { %v4254_v48 = vpop.f32.mrb[2].mxu0  ;;  %v1676_v53 = vmul.f32 0.5, %v4554_v46  ;;  %v5766_v46 = vld [vmem:[%s6397_s3 + $0x60] sm:$0xff] }
 0x15c   :  { %v4555_v51 = vadd.f32 %v4254_v48, %v5701_v47  ;;  %v1591_v52 = vpop.f32.mrb[3].mxu0  ;;  %4805 = vtanh.f32 %v1677_v50 }
 0x15d   :  { %v4556_v55 = vadd.f32 %v1591_v52, %v5706_v49  ;;  %4807 = vtanh.f32 %v1676_v53 }
 0x15e   :  { %v1679_v57 = vmul.f32 0.5, %v4555_v51 }
 0x15f   :  { %v4257_v58 = vpop.f32.mrb[4].mxu0  ;;  %v1678_v63 = vmul.f32 0.5, %v4556_v55 }
 0x160   :  { %v4557_v59 = vadd.f32 %v4257_v58, %v5712_v54  ;;  %v1601_v60 = vpop.f32.mrb[5].mxu0  ;;  %4809 = vtanh.f32 %v1679_v57 }
 0x161   :  { %v4558_v61 = vadd.f32 %v1601_v60, %v5718_v56  ;;  %v5773_v60 = vld [vmem:[%s6397_s3 + $0x78] sm:$0xff] }
 0x162   :  { %v1693_v0 = vmul.f32 0.5, %v4557_v59 }
 0x163   :  { %v1692_v2 = vmul.f32 0.5, %v4558_v61  ;;  %v4260_v3 = vpop.f32.mrb[6].mxu0 }
 0x164   :  { %4811 = vtanh.f32 %v1693_v0  ;;  %v4559_v4 = vadd.f32 %v4260_v3, %v5725_v62  ;;  %v1611_v5 = vpop.f32.mrb[7].mxu0 }
 0x165   :  { %4813 = vtanh.f32 %v1692_v2  ;;  %v4560_v6 = vadd.f32 %v1611_v5, %v5730_v1 }
 0x166   :  { %4815 = vtanh.f32 %v1678_v63  ;;  %v1695_v8 = vmul.f32 0.5, %v4559_v4  ;;  %v4806_v16 = vpop.eup %4805  ;;  %v5778_v4 = vld [vmem:[%s6397_s3 + $0x70] sm:$0xff] }
 0x167   :  { %v1694_v10 = vmul.f32 0.5, %v4560_v6  ;;  %v4263_v11 = vpop.f32.mrb[8].mxu0  ;;  %v4808_v18 = vpop.eup %4807  ;;  %v1685_v44 = vmul.f32 0.5, %v4806_v16 }
 0x168   :  { %4817 = vtanh.f32 %v1695_v8  ;;  %v4561_v12 = vadd.f32 %v4263_v11, %v5737_v7  ;;  %v1621_v13 = vpop.f32.mrb[9].mxu0  ;;  %v1684_v45 = vmul.f32 0.5, %v4808_v18 }
 0x169   :  { %4819 = vtanh.f32 %v1694_v10  ;;  %v4562_v14 = vadd.f32 %v1621_v13, %v5742_v9  ;;  %v1689_v63 = vadd.f32 0.5, %v1685_v44 }
 0x16a   :  { %4821 = vtanh.f32 %v4561_v12  ;;  %v4810_v22 = vpop.eup %4809  ;;  %v1688_v0 = vadd.f32 0.5, %v1684_v45 }
 0x16b   :  { %4823 = vtanh.f32 %v4562_v14  ;;  %v4266_v19 = vpop.f32.mrb[10].mxu0  ;;  %v1687_v6 = vmul.f32 0.5, %v4810_v22 }
 0x16c   :  { %v4563_v20 = vadd.f32 %v4266_v19, %v5749_v15  ;;  %v1631_v21 = vpop.f32.mrb[11].mxu0 }
 0x16d   :  { %v4564_v23 = vadd.f32 %v1631_v21, %v5754_v17 }
 0x16e   :  { %v4812_v43 = vpop.eup %4811  ;;  %4825 = vtanh.f32 %v4563_v20 }
 0x16f   :  { %v4814_v48 = vpop.eup %4813  ;;  %v1701_v50 = vmul.f32 0.5, %v4812_v43  ;;  %4827 = vtanh.f32 %v4564_v23  ;;  %v4269_v51 = vpop.f32.mrb[12].mxu0 }
 0x170   :  { %v4816_v52 = vpop.eup %4815  ;;  %v1700_v53 = vmul.f32 0.5, %v4814_v48  ;;  %v4565_v55 = vadd.f32 %v4269_v51, %v5761_v40  ;;  %v1641_v57 = vpop.f32.mrb[13].mxu0 }
 0x171   :  { %v1705_v58 = vadd.f32 0.5, %v1701_v50  ;;  %v4566_v59 = vadd.f32 %v1641_v57, %v5766_v46  ;;  %v1686_v8 = vmul.f32 0.5, %v4816_v52  ;;  %v1691_v50 = vadd.f32 0.5, %v1687_v6 }
 0x172   :  { %v4818_v61 = vpop.eup %4817  ;;  %v1704_v2 = vadd.f32 0.5, %v1700_v53  ;;  %v1713_v3 = vmul.f32 0.5, %v4565_v55 }
 0x173   :  { %v4820_v5 = vpop.eup %4819  ;;  %v1703_v10 = vmul.f32 0.5, %v4818_v61  ;;  %v1712_v11 = vmul.f32 0.5, %v4566_v59  ;;  %v4272_v12 = vpop.f32.mrb[14].mxu0  ;;  %v1729_v14 = vmul.f32 0.0, %v1705_v58  ;;  %v1690_v55 = vadd.f32 0.5, %v1686_v8 }
 0x174   :  { %v4822_v13 = vpop.eup %4821  ;;  %v1702_v16 = vmul.f32 0.5, %v4820_v5  ;;  %4829 = vtanh.f32 %v1713_v3  ;;  %v4567_v18 = vadd.f32 %v4272_v12, %v5773_v60  ;;  %v1651_v19 = vpop.f32.mrb[15].mxu0  ;;  %v1728_v44 = vmul.f32 0.0, %v1704_v2 }
 0x175   :  { %v4824_v20 = vpop.eup %4823  ;;  %v1707_v21 = vadd.f32 0.5, %v1703_v10  ;;  %v1733_v23 = vmul.f32 %v4822_v13, %v1689_v63  ;;  %4831 = vtanh.f32 %v1712_v11  ;;  %v4568_v43 = vadd.f32 %v1651_v19, %v5778_v4 }
 0x176   :  { %v1706_v45 = vadd.f32 0.5, %v1702_v16  ;;  %v1732_v22 = vmul.f32 %v4824_v20, %v1688_v0  ;;  %v1715_v48 = vmul.f32 0.5, %v4567_v18 }
 0x177   :  { %v5782_v51 = vadd.f32 %v1733_v23, %v1729_v14  ;;  %v1714_v52 = vmul.f32 0.5, %v4568_v43  ;;  %v1731_v59 = vmul.f32 0.0, %v1707_v21 }
 0x178   :  { %v4826_v53 = vpop.eup %4825  ;;  %v5784_v57 = vadd.f32 %v1732_v22, %v1728_v44  ;;  %4833 = vtanh.f32 %v1715_v48  ;;  %v1730_v63 = vmul.f32 0.0, %v1706_v45 }
 0x179   :  { %v4828_v58 = vpop.eup %4827  ;;  %4835 = vtanh.f32 %v5782_v51  ;;  %v1735_v61 = vmul.f32 %v4826_v53, %v1691_v50 }
 0x17a   :  { %4837 = vtanh.f32 %v5784_v57  ;;  %v1734_v2 = vmul.f32 %v4828_v58, %v1690_v55  ;;  %v4243_v55 = vpop.f32.mrb[60].mxu1 }
 0x17b   :  { %v5788_v0 = vadd.f32 %v1735_v61, %v1731_v59  ;;  %4839 = vtanh.f32 %v1714_v52  ;;  %v1414_v58 = vpop.f32.mrb[61].mxu1 }
 0x17c   :  { %v5790_v3 = vadd.f32 %v1734_v2, %v1730_v63  ;;  %v4246_v59 = vpop.f32.mrb[62].mxu1 }
 0x17d   :  { %4841 = vtanh.f32 %v5788_v0  ;;  %v1424_v61 = vpop.f32.mrb[63].mxu1 }
 0x17e   :  { %v4830_v5 = vpop.eup %4829  ;;  %4843 = vtanh.f32 %v5790_v3 }
 0x17f   :  { %v4832_v6 = vpop.eup %4831  ;;  %v1721_v8 = vmul.f32 0.5, %v4830_v5 }
 0x180   :  { %v1720_v10 = vmul.f32 0.5, %v4832_v6 }
 0x181   :  { %v1725_v11 = vadd.f32 0.5, %v1721_v8 }
 0x182   :  { %v4834_v12 = vpop.eup %4833  ;;  %v1724_v13 = vadd.f32 0.5, %v1720_v10 }
 0x183   :  { %v4836_v14 = vpop.eup %4835  ;;  %v1723_v16 = vmul.f32 0.5, %v4834_v12 }
 0x184   :  { %v4838_v18 = vpop.eup %4837  ;;  %v1745_v19 = vmul.f32 %v4836_v14, %v1725_v11 }
 0x185   :  { %v4840_v20 = vpop.eup %4839  ;;  %v1727_v21 = vadd.f32 0.5, %v1723_v16  ;;  %v1744_v23 = vmul.f32 %v4838_v18, %v1724_v13 }
 0x186   :  { %v1722_v43 = vmul.f32 0.5, %v4840_v20 }
 0x187   :  { %v4842_v44 = vpop.eup %4841  ;;  %v4497_v45 = vpack.c.bf16 %v1745_v19, %v1744_v23 }
 0x188   :  { %v4844_v22 = vpop.eup %4843  ;;  %v1726_v48 = vadd.f32 0.5, %v1722_v43  ;;  %v1747_v50 = vmul.f32 %v4842_v44, %v1727_v21 }
 0x189   :  { %4498 = vmatprep.subr.bf16.mxu1 %v4497_v45 }
 0x18a   :  { %4500 = vmatpush3.bf16.msra.mxu1 %v4497_v45  ;;  %v1746_v52 = vmul.f32 %v4844_v22, %v1726_v48 }
 0x18c   :  { %v4501_v53 = vpack.c.bf16 %v1747_v50, %v1746_v52 }
 0x18e   :  { %4502 = vmatprep.subr.bf16.mxu1 %v4501_v53 }
 0x18f   :  { %4504 = vmatpush3.bf16.msra.mxu1 %v4501_v53 }
 0x192   :  { %4282 = vmatmul.mubr.msk.f32.vlgmr.msra.gmra.mrb[0].mxu1 %vm1466_vm2, %v5545_v25 }
 0x193   :  { %4284 = vmatprep.mubr.msk.f32.mxu1 %vm1466_vm2, %v5550_v26 }
 0x196   :  { %4285 = vmatmul.mubr.msk.f32.gmra.mrb[2].mxu1 %vm1466_vm2, %v5559_v27 }
 0x197   :  { %4287 = vmatprep.mubr.msk.f32.mxu1 %vm1466_vm2, %v5564_v28 }
 0x19a   :  { %4288 = vmatmul.mubr.msk.f32.gmra.mrb[4].mxu1 %vm1466_vm2, %v5573_v29 }
 0x19b   :  { %4290 = vmatprep.mubr.msk.f32.mxu1 %vm1466_vm2, %v5578_v30 }
 0x19e   :  { %4291 = vmatmul.mubr.msk.f32.gmra.mrb[6].mxu1 %vm1466_vm2, %v5587_v31 }
 0x19f   :  { %4293 = vmatprep.mubr.msk.f32.mxu1 %vm1466_vm2, %v5592_v32 }
 0x1a2   :  { %4294 = vmatmul.mubr.msk.f32.gmra.mrb[8].mxu1 %vm1466_vm2, %v5601_v33 }
 0x1a3   :  { %4296 = vmatprep.mubr.msk.f32.mxu1 %vm1466_vm2, %v5606_v34 }
 0x1a6   :  { %4297 = vmatmul.mubr.msk.f32.gmra.mrb[10].mxu1 %vm1466_vm2, %v5615_v35 }
 0x1a7   :  { %4299 = vmatprep.mubr.msk.f32.mxu1 %vm1466_vm2, %v5620_v36 }
 0x1aa   :  { %4300 = vmatmul.mubr.msk.f32.gmra.mrb[12].mxu1 %vm1466_vm2, %v5629_v37 }
 0x1ab   :  { %4302 = vmatprep.mubr.msk.f32.mxu1 %vm1466_vm2, %v5634_v38 }
 0x1ae   :  { %4303 = vmatmul.mubr.msk.f32.gmra.mrb[14].mxu1 %vm1466_vm2, %v5643_v39 }
 0x1af   :  { %4345 = vmatprep.mubr.msk.f32.mxu1 %vm1466_vm2, %v5532_v24 }
 0x265   :  { %v4283_v63 = vpop.f32.mrb[0].mxu1 }
 0x266   :  { %v4569_v2 = vadd.f32 %v4283_v63, %v5689_v41  ;;  %v1830_v5 = vpop.f32.mrb[1].mxu1 }
 0x267   :  { %v4570_v6 = vadd.f32 %v1830_v5, %v5694_v42 }
 0x268   :  { %v1926_v10 = vmul.f32 0.5, %v4569_v2 }
 0x269   :  { %v4286_v8 = vpop.f32.mrb[2].mxu1  ;;  %v1925_v13 = vmul.f32 0.5, %v4570_v6 }
 0x26a   :  { %v4571_v11 = vadd.f32 %v4286_v8, %v5701_v47  ;;  %v1840_v12 = vpop.f32.mrb[3].mxu1  ;;  %4845 = vtanh.f32 %v1926_v10 }
 0x26b   :  { %v4572_v14 = vadd.f32 %v1840_v12, %v5706_v49  ;;  %4847 = vtanh.f32 %v1925_v13 }
 0x26c   :  { %v1928_v16 = vmul.f32 0.5, %v4571_v11 }
 0x26d   :  { %v4289_v18 = vpop.f32.mrb[4].mxu1  ;;  %v1927_v23 = vmul.f32 0.5, %v4572_v14 }
 0x26e   :  { %v4573_v19 = vadd.f32 %v4289_v18, %v5712_v54  ;;  %v1850_v20 = vpop.f32.mrb[5].mxu1  ;;  %4849 = vtanh.f32 %v1928_v16 }
 0x26f   :  { %v4574_v21 = vadd.f32 %v1850_v20, %v5718_v56 }
 0x270   :  { %v1942_v43 = vmul.f32 0.5, %v4573_v19 }
 0x271   :  { %v1941_v44 = vmul.f32 0.5, %v4574_v21  ;;  %v4292_v45 = vpop.f32.mrb[6].mxu1 }
 0x272   :  { %4851 = vtanh.f32 %v1942_v43  ;;  %v4575_v22 = vadd.f32 %v4292_v45, %v5725_v62  ;;  %v1860_v48 = vpop.f32.mrb[7].mxu1 }
 0x273   :  { %4853 = vtanh.f32 %v1941_v44  ;;  %v4576_v50 = vadd.f32 %v1860_v48, %v5730_v1 }
 0x274   :  { %4855 = vtanh.f32 %v1927_v23  ;;  %v1944_v52 = vmul.f32 0.5, %v4575_v22  ;;  %v4846_v63 = vpop.eup %4845 }
 0x275   :  { %v1943_v53 = vmul.f32 0.5, %v4576_v50  ;;  %v4295_v55 = vpop.f32.mrb[8].mxu1  ;;  %v4848_v2 = vpop.eup %4847  ;;  %v1934_v13 = vmul.f32 0.5, %v4846_v63 }
 0x276   :  { %4857 = vtanh.f32 %v1944_v52  ;;  %v4577_v58 = vadd.f32 %v4295_v55, %v5737_v7  ;;  %v1870_v59 = vpop.f32.mrb[9].mxu1  ;;  %v1933_v14 = vmul.f32 0.5, %v4848_v2 }
 0x277   :  { %4859 = vtanh.f32 %v1943_v53  ;;  %v4578_v61 = vadd.f32 %v1870_v59, %v5742_v9  ;;  %v1938_v48 = vadd.f32 0.5, %v1934_v13 }
 0x278   :  { %4861 = vtanh.f32 %v4577_v58  ;;  %v4850_v10 = vpop.eup %4849  ;;  %v1937_v50 = vadd.f32 0.5, %v1933_v14 }
 0x279   :  { %4863 = vtanh.f32 %v4578_v61  ;;  %v4298_v5 = vpop.f32.mrb[10].mxu1  ;;  %v1936_v58 = vmul.f32 0.5, %v4850_v10 }
 0x27a   :  { %v4579_v6 = vadd.f32 %v4298_v5, %v5749_v15  ;;  %v1880_v8 = vpop.f32.mrb[11].mxu1 }
 0x27b   :  { %v4580_v11 = vadd.f32 %v1880_v8, %v5754_v17 }
 0x27c   :  { %v4852_v12 = vpop.eup %4851  ;;  %4865 = vtanh.f32 %v4579_v6 }
 0x27d   :  { %v4854_v16 = vpop.eup %4853  ;;  %v1950_v18 = vmul.f32 0.5, %v4852_v12  ;;  %4867 = vtanh.f32 %v4580_v11  ;;  %v4301_v19 = vpop.f32.mrb[12].mxu1 }
 0x27e   :  { %v4856_v20 = vpop.eup %4855  ;;  %v1949_v21 = vmul.f32 0.5, %v4854_v16  ;;  %v4581_v23 = vadd.f32 %v4301_v19, %v5761_v40  ;;  %v1890_v43 = vpop.f32.mrb[13].mxu1 }
 0x27f   :  { %v1954_v44 = vadd.f32 0.5, %v1950_v18  ;;  %v4582_v45 = vadd.f32 %v1890_v43, %v5766_v46  ;;  %v1935_v59 = vmul.f32 0.5, %v4856_v20 }
 0x280   :  { %v4858_v22 = vpop.eup %4857  ;;  %v1953_v52 = vadd.f32 0.5, %v1949_v21  ;;  %v1962_v53 = vmul.f32 0.5, %v4581_v23  ;;  %v1940_v23 = vadd.f32 0.5, %v1936_v58 }
 0x281   :  { %v4860_v55 = vpop.eup %4859  ;;  %v1952_v61 = vmul.f32 0.5, %v4858_v22  ;;  %v1961_v63 = vmul.f32 0.5, %v4582_v45  ;;  %v4304_v2 = vpop.f32.mrb[14].mxu1  ;;  %v1978_v6 = vmul.f32 %v1954_v44, %v5782_v51  ;;  %v1939_v45 = vadd.f32 0.5, %v1935_v59 }
 0x282   :  { %v4862_v5 = vpop.eup %4861  ;;  %v1951_v8 = vmul.f32 0.5, %v4860_v55  ;;  %4869 = vtanh.f32 %v1962_v53  ;;  %v4583_v11 = vadd.f32 %v4304_v2, %v5773_v60  ;;  %v1900_v12 = vpop.f32.mrb[15].mxu1  ;;  %v1977_v10 = vmul.f32 %v1953_v52, %v5784_v57 }
 0x283   :  { %v4864_v16 = vpop.eup %4863  ;;  %v1956_v18 = vadd.f32 0.5, %v1952_v61  ;;  %v1982_v13 = vmul.f32 %v4862_v5, %v1938_v48  ;;  %4871 = vtanh.f32 %v1961_v63  ;;  %v4584_v14 = vadd.f32 %v1900_v12, %v5778_v4 }
 0x284   :  { %v1955_v19 = vadd.f32 0.5, %v1951_v8  ;;  %v1981_v20 = vmul.f32 %v4864_v16, %v1937_v50  ;;  %v1964_v21 = vmul.f32 0.5, %v4583_v11 }
 0x285   :  { %v5844_v43 = vadd.f32 %v1982_v13, %v1978_v6  ;;  %v1963_v51 = vmul.f32 0.5, %v4584_v14  ;;  %v1980_v48 = vmul.f32 %v1956_v18, %v5788_v0 }
 0x286   :  { %v4866_v44 = vpop.eup %4865  ;;  %v5846_v22 = vadd.f32 %v1981_v20, %v1977_v10  ;;  %4873 = vtanh.f32 %v1964_v21  ;;  %v1979_v57 = vmul.f32 %v1955_v19, %v5790_v3 }
 0x287   :  { %v4868_v53 = vpop.eup %4867  ;;  %4875 = vtanh.f32 %v5844_v43  ;;  %v1984_v55 = vmul.f32 %v4866_v44, %v1940_v23 }
 0x288   :  { %4877 = vtanh.f32 %v5846_v22  ;;  %v1983_v50 = vmul.f32 %v4868_v53, %v1939_v45 }
 0x289   :  { %v5852_v52 = vadd.f32 %v1984_v55, %v1980_v48  ;;  %4879 = vtanh.f32 %v1963_v51 }
 0x28a   :  { %v5854_v58 = vadd.f32 %v1983_v50, %v1979_v57 }
 0x28b   :  { %4881 = vtanh.f32 %v5852_v52 }
 0x28c   :  { %v4870_v59 = vpop.eup %4869  ;;  %4883 = vtanh.f32 %v5854_v58 }
 0x28d   :  { %v4872_v61 = vpop.eup %4871  ;;  %v1970_v0 = vmul.f32 0.5, %v4870_v59 }
 0x28e   :  { %v1969_v63 = vmul.f32 0.5, %v4872_v61 }
 0x28f   :  { %v1974_v2 = vadd.f32 0.5, %v1970_v0 }
 0x290   :  { %v4874_v5 = vpop.eup %4873  ;;  %v1973_v6 = vadd.f32 0.5, %v1969_v63 }
 0x291   :  { %v4876_v3 = vpop.eup %4875  ;;  %v1972_v8 = vmul.f32 0.5, %v4874_v5 }
 0x292   :  { %v4878_v11 = vpop.eup %4877  ;;  %v1994_v12 = vmul.f32 %v4876_v3, %v1974_v2 }
 0x293   :  { %v4880_v16 = vpop.eup %4879  ;;  %v1976_v18 = vadd.f32 0.5, %v1972_v8  ;;  %v1993_v13 = vmul.f32 %v4878_v11, %v1973_v6 }
 0x294   :  { %v1971_v14 = vmul.f32 0.5, %v4880_v16 }
 0x295   :  { %v4882_v10 = vpop.eup %4881  ;;  %v4505_v19 = vpack.c.bf16 %v1994_v12, %v1993_v13 }
 0x296   :  { %v4884_v20 = vpop.eup %4883  ;;  %v1975_v21 = vadd.f32 0.5, %v1971_v14  ;;  %v1996_v23 = vmul.f32 %v4882_v10, %v1976_v18 }
 0x297   :  { %4506 = vmatprep.subr.bf16.mxu0 %v4505_v19 }
 0x298   :  { %4508 = vmatpush3.bf16.msra.mxu0 %v4505_v19  ;;  %v1995_v51 = vmul.f32 %v4884_v20, %v1975_v21 }
 0x29a   :  { %v4509_v44 = vpack.c.bf16 %v1996_v23, %v1995_v51 }
 0x29c   :  { %4510 = vmatprep.subr.bf16.mxu0 %v4509_v44 }
 0x29d   :  { %4512 = vmatpush3.bf16.msra.mxu0 %v4509_v44 }
 0x2a0   :  { %4314 = vmatmul.mubr.msk.f32.vlgmr.msra.gmra.mrb[16].mxu0 %vm1466_vm2, %v5545_v25 }
 0x2a1   :  { %4316 = vmatprep.mubr.msk.f32.mxu0 %vm1466_vm2, %v5550_v26 }
 0x2a4   :  { %4317 = vmatmul.mubr.msk.f32.gmra.mrb[18].mxu0 %vm1466_vm2, %v5559_v27 }
 0x2a5   :  { %4319 = vmatprep.mubr.msk.f32.mxu0 %vm1466_vm2, %v5564_v28 }
 0x2a8   :  { %4320 = vmatmul.mubr.msk.f32.gmra.mrb[20].mxu0 %vm1466_vm2, %v5573_v29 }
 0x2a9   :  { %4322 = vmatprep.mubr.msk.f32.mxu0 %vm1466_vm2, %v5578_v30 }
 0x2ac   :  { %4323 = vmatmul.mubr.msk.f32.gmra.mrb[22].mxu0 %vm1466_vm2, %v5587_v31 }
 0x2ad   :  { %4325 = vmatprep.mubr.msk.f32.mxu0 %vm1466_vm2, %v5592_v32 }
 0x2b0   :  { %4326 = vmatmul.mubr.msk.f32.gmra.mrb[24].mxu0 %vm1466_vm2, %v5601_v33 }
 0x2b1   :  { %4328 = vmatprep.mubr.msk.f32.mxu0 %vm1466_vm2, %v5606_v34 }
 0x2b4   :  { %4329 = vmatmul.mubr.msk.f32.gmra.mrb[26].mxu0 %vm1466_vm2, %v5615_v35 }
 0x2b5   :  { %4331 = vmatprep.mubr.msk.f32.mxu0 %vm1466_vm2, %v5620_v36 }
 0x2b8   :  { %4332 = vmatmul.mubr.msk.f32.gmra.mrb[28].mxu0 %vm1466_vm2, %v5629_v37 }
 0x2b9   :  { %4334 = vmatprep.mubr.msk.f32.mxu0 %vm1466_vm2, %v5634_v38 }
 0x2bc   :  { %4335 = vmatmul.mubr.msk.f32.gmra.mrb[30].mxu0 %vm1466_vm2, %v5643_v39 }
 0x2bd   :  { %4377 = vmatprep.mubr.msk.f32.mxu0 %vm1466_vm2, %v5532_v24 }
 0x373   :  { %v4315_v45 = vpop.f32.mrb[16].mxu0 }
 0x374   :  { %v4585_v53 = vadd.f32 %v4315_v45, %v5689_v41  ;;  %v2079_v48 = vpop.f32.mrb[17].mxu0 }
 0x375   :  { %v4586_v55 = vadd.f32 %v2079_v48, %v5694_v42 }
 0x376   :  { %v2175_v50 = vmul.f32 0.5, %v4585_v53 }
 0x377   :  { %v4318_v57 = vpop.f32.mrb[18].mxu0  ;;  %v2174_v0 = vmul.f32 0.5, %v4586_v55 }
 0x378   :  { %v4587_v59 = vadd.f32 %v4318_v57, %v5701_v47  ;;  %v2089_v61 = vpop.f32.mrb[19].mxu0  ;;  %4885 = vtanh.f32 %v2175_v50 }
 0x379   :  { %v4588_v63 = vadd.f32 %v2089_v61, %v5706_v49  ;;  %4887 = vtanh.f32 %v2174_v0 }
 0x37a   :  { %v2177_v2 = vmul.f32 0.5, %v4587_v59 }
 0x37b   :  { %v4321_v5 = vpop.f32.mrb[20].mxu0  ;;  %v2176_v8 = vmul.f32 0.5, %v4588_v63 }
 0x37c   :  { %v4589_v6 = vadd.f32 %v4321_v5, %v5712_v54  ;;  %v2099_v24 = vpop.f32.mrb[21].mxu0  ;;  %4889 = vtanh.f32 %v2177_v2 }
 0x37d   :  { %v4590_v3 = vadd.f32 %v2099_v24, %v5718_v56 }
 0x37e   :  { %v2191_v11 = vmul.f32 0.5, %v4589_v6 }
 0x37f   :  { %v2190_v12 = vmul.f32 0.5, %v4590_v3  ;;  %v4324_v16 = vpop.f32.mrb[22].mxu0 }
 0x380   :  { %4891 = vtanh.f32 %v2191_v11  ;;  %v4591_v18 = vadd.f32 %v4324_v16, %v5725_v62  ;;  %v2109_v13 = vpop.f32.mrb[23].mxu0 }
 0x381   :  { %4893 = vtanh.f32 %v2190_v12  ;;  %v4592_v14 = vadd.f32 %v2109_v13, %v5730_v1 }
 0x382   :  { %4895 = vtanh.f32 %v2176_v8  ;;  %v2193_v10 = vmul.f32 0.5, %v4591_v18  ;;  %v4886_v44 = vpop.eup %4885 }
 0x383   :  { %v2192_v19 = vmul.f32 0.5, %v4592_v14  ;;  %v4327_v20 = vpop.f32.mrb[24].mxu0  ;;  %v4888_v45 = vpop.eup %4887  ;;  %v2183_v61 = vmul.f32 0.5, %v4886_v44 }
 0x384   :  { %4897 = vtanh.f32 %v2193_v10  ;;  %v4593_v21 = vadd.f32 %v4327_v20, %v5737_v7  ;;  %v2119_v23 = vpop.f32.mrb[25].mxu0  ;;  %v2182_v0 = vmul.f32 0.5, %v4888_v45 }
 0x385   :  { %4899 = vtanh.f32 %v2192_v19  ;;  %v4594_v51 = vadd.f32 %v2119_v23, %v5742_v9  ;;  %v2187_v18 = vadd.f32 0.5, %v2183_v61 }
 0x386   :  { %4901 = vtanh.f32 %v4593_v21  ;;  %v4890_v57 = vpop.eup %4889  ;;  %v2186_v13 = vadd.f32 0.5, %v2182_v0 }
 0x387   :  { %4903 = vtanh.f32 %v4594_v51  ;;  %v4330_v53 = vpop.f32.mrb[26].mxu0  ;;  %v2185_v20 = vmul.f32 0.5, %v4890_v57 }
 0x388   :  { %v4595_v48 = vadd.f32 %v4330_v53, %v5749_v15  ;;  %v2129_v55 = vpop.f32.mrb[27].mxu0 }
 0x389   :  { %v4596_v50 = vadd.f32 %v2129_v55, %v5754_v17 }
 0x38a   :  { %v4892_v59 = vpop.eup %4891  ;;  %4905 = vtanh.f32 %v4595_v48 }
 0x38b   :  { %v4894_v63 = vpop.eup %4893  ;;  %v2199_v2 = vmul.f32 0.5, %v4892_v59  ;;  %4907 = vtanh.f32 %v4596_v50  ;;  %v4333_v5 = vpop.f32.mrb[28].mxu0 }
 0x38c   :  { %v4896_v6 = vpop.eup %4895  ;;  %v2198_v24 = vmul.f32 0.5, %v4894_v63  ;;  %v4597_v3 = vadd.f32 %v4333_v5, %v5761_v40  ;;  %v2139_v8 = vpop.f32.mrb[29].mxu0 }
 0x38d   :  { %v2203_v11 = vadd.f32 0.5, %v2199_v2  ;;  %v4598_v12 = vadd.f32 %v2139_v8, %v5766_v46  ;;  %v2184_v21 = vmul.f32 0.5, %v4896_v6 }
 0x38e   :  { %v4898_v16 = vpop.eup %4897  ;;  %v2202_v14 = vadd.f32 0.5, %v2198_v24  ;;  %v2211_v10 = vmul.f32 0.5, %v4597_v3  ;;  %v2189_v24 = vadd.f32 0.5, %v2185_v20 }
 0x38f   :  { %v4900_v19 = vpop.eup %4899  ;;  %v2201_v23 = vmul.f32 0.5, %v4898_v16  ;;  %v2210_v51 = vmul.f32 0.5, %v4598_v12  ;;  %v4336_v44 = vpop.f32.mrb[30].mxu0  ;;  %v2227_v53 = vmul.f32 %v2203_v11, %v5844_v43  ;;  %v2188_v11 = vadd.f32 0.5, %v2184_v21 }
 0x390   :  { %v4902_v45 = vpop.eup %4901  ;;  %v2200_v48 = vmul.f32 0.5, %v4900_v19  ;;  %4909 = vtanh.f32 %v2211_v10  ;;  %v4599_v55 = vadd.f32 %v4336_v44, %v5773_v60  ;;  %v2149_v50 = vpop.f32.mrb[31].mxu0  ;;  %v2226_v57 = vmul.f32 %v2202_v14, %v5846_v22 }
 0x391   :  { %v4904_v59 = vpop.eup %4903  ;;  %v2205_v63 = vadd.f32 0.5, %v2201_v23  ;;  %v2231_v61 = vmul.f32 %v4902_v45, %v2187_v18  ;;  %4911 = vtanh.f32 %v2210_v51  ;;  %v4600_v0 = vadd.f32 %v2149_v50, %v5778_v4 }
 0x392   :  { %v2204_v2 = vadd.f32 0.5, %v2200_v48  ;;  %v2230_v5 = vmul.f32 %v4904_v59, %v2186_v13  ;;  %v2213_v6 = vmul.f32 0.5, %v4599_v55 }
 0x393   :  { %v5908_v3 = vadd.f32 %v2231_v61, %v2227_v53  ;;  %v2212_v43 = vmul.f32 0.5, %v4600_v0  ;;  %v2229_v18 = vmul.f32 %v2205_v63, %v5852_v52 }
 0x394   :  { %v4906_v8 = vpop.eup %4905  ;;  %v5910_v12 = vadd.f32 %v2230_v5, %v2226_v57  ;;  %4913 = vtanh.f32 %v2213_v6  ;;  %v2228_v22 = vmul.f32 %v2204_v2, %v5854_v58 }
 0x395   :  { %v4908_v16 = vpop.eup %4907  ;;  %4915 = vtanh.f32 %v5908_v3  ;;  %v2233_v10 = vmul.f32 %v4906_v8, %v2189_v24 }
 0x396   :  { %4917 = vtanh.f32 %v5910_v12  ;;  %v2232_v13 = vmul.f32 %v4908_v16, %v2188_v11 }
 0x397   :  { %v5916_v14 = vadd.f32 %v2233_v10, %v2229_v18  ;;  %4919 = vtanh.f32 %v2212_v43 }
 0x398   :  { %v5918_v19 = vadd.f32 %v2232_v13, %v2228_v22 }
 0x399   :  { %4921 = vtanh.f32 %v5916_v14 }
 0x39a   :  { %v4910_v20 = vpop.eup %4909  ;;  %4923 = vtanh.f32 %v5918_v19 }
 0x39b   :  { %v4912_v21 = vpop.eup %4911  ;;  %v2219_v52 = vmul.f32 0.5, %v4910_v20 }
 0x39c   :  { %v2218_v23 = vmul.f32 0.5, %v4912_v21 }
 0x39d   :  { %v2223_v51 = vadd.f32 0.5, %v2219_v52 }
 0x39e   :  { %v4914_v44 = vpop.eup %4913  ;;  %v2222_v45 = vadd.f32 0.5, %v2218_v23 }
 0x39f   :  { %v4916_v58 = vpop.eup %4915  ;;  %v2221_v53 = vmul.f32 0.5, %v4914_v44 }
 0x3a0   :  { %v4918_v48 = vpop.eup %4917  ;;  %v2243_v55 = vmul.f32 %v4916_v58, %v2223_v51 }
 0x3a1   :  { %v4920_v50 = vpop.eup %4919  ;;  %v2225_v59 = vadd.f32 0.5, %v2221_v53  ;;  %v2242_v63 = vmul.f32 %v4918_v48, %v2222_v45 }
 0x3a2   :  { %v2220_v61 = vmul.f32 0.5, %v4920_v50 }
 0x3a3   :  { %v4922_v0 = vpop.eup %4921  ;;  %v4513_v57 = vpack.c.bf16 %v2243_v55, %v2242_v63 }
 0x3a4   :  { %v4924_v2 = vpop.eup %4923  ;;  %v2224_v5 = vadd.f32 0.5, %v2220_v61  ;;  %v2245_v6 = vmul.f32 %v4922_v0, %v2225_v59 }
 0x3a5   :  { %4514 = vmatprep.subr.bf16.mxu1 %v4513_v57 }
 0x3a6   :  { %4516 = vmatpush3.bf16.msra.mxu1 %v4513_v57  ;;  %v2244_v24 = vmul.f32 %v4924_v2, %v2224_v5 }
 0x3a8   :  { %v4517_v43 = vpack.c.bf16 %v2245_v6, %v2244_v24 }
 0x3aa   :  { %4518 = vmatprep.subr.bf16.mxu1 %v4517_v43 }
 0x3ab   :  { %4520 = vmatpush3.bf16.msra.mxu1 %v4517_v43 }
 0x3ae   :  { %4346 = vmatmul.mubr.msk.f32.vlgmr.msra.gmra.mrb[16].mxu1 %vm1466_vm2, %v5545_v25  ;;  %v5955_v25 = vld [vmem:[%s6396_s2] sm:$0xff] }
 0x3af   :  { %4348 = vmatprep.mubr.msk.f32.mxu1 %vm1466_vm2, %v5550_v26 }
 0x3b2   :  { %4349 = vmatmul.mubr.msk.f32.gmra.mrb[18].mxu1 %vm1466_vm2, %v5559_v27 }
 0x3b3   :  { %4351 = vmatprep.mubr.msk.f32.mxu1 %vm1466_vm2, %v5564_v28 }
 0x3b6   :  { %4352 = vmatmul.mubr.msk.f32.gmra.mrb[20].mxu1 %vm1466_vm2, %v5573_v29 }
 0x3b7   :  { %4354 = vmatprep.mubr.msk.f32.mxu1 %vm1466_vm2, %v5578_v30 }
 0x3ba   :  { %4355 = vmatmul.mubr.msk.f32.gmra.mrb[22].mxu1 %vm1466_vm2, %v5587_v31 }
 0x3bb   :  { %4357 = vmatprep.mubr.msk.f32.mxu1 %vm1466_vm2, %v5592_v32 }
 0x3be   :  { %4358 = vmatmul.mubr.msk.f32.gmra.mrb[24].mxu1 %vm1466_vm2, %v5601_v33 }
 0x3bf   :  { %4360 = vmatprep.mubr.msk.f32.mxu1 %vm1466_vm2, %v5606_v34 }
 0x3c2   :  { %4361 = vmatmul.mubr.msk.f32.gmra.mrb[26].mxu1 %vm1466_vm2, %v5615_v35 }
 0x3c3   :  { %4363 = vmatprep.mubr.msk.f32.mxu1 %vm1466_vm2, %v5620_v36 }
 0x3c6   :  { %4364 = vmatmul.mubr.msk.f32.gmra.mrb[28].mxu1 %vm1466_vm2, %v5629_v37 }
 0x3c7   :  { %4366 = vmatprep.mubr.msk.f32.mxu1 %vm1466_vm2, %v5634_v38 }
 0x3ca   :  { %4367 = vmatmul.mubr.msk.f32.gmra.mrb[30].mxu1 %vm1466_vm2, %v5643_v39 }
 0x3cb   :  { %4409 = vmatprep.mubr.msk.f32.mxu1 %vm1466_vm2, %v5955_v25 }
 0x481   :  { %v4347_v26 = vpop.f32.mrb[16].mxu1 }
 0x482   :  { %v4601_v27 = vadd.f32 %v4347_v26, %v5689_v41  ;;  %v2328_v28 = vpop.f32.mrb[17].mxu1 }
 0x483   :  { %v4602_v29 = vadd.f32 %v2328_v28, %v5694_v42 }
 0x484   :  { %v2424_v31 = vmul.f32 0.5, %v4601_v27 }
 0x485   :  { %v4350_v30 = vpop.f32.mrb[18].mxu1  ;;  %v2423_v34 = vmul.f32 0.5, %v4602_v29 }
 0x486   :  { %v4603_v32 = vadd.f32 %v4350_v30, %v5701_v47  ;;  %v2338_v33 = vpop.f32.mrb[19].mxu1  ;;  %4925 = vtanh.f32 %v2424_v31 }
 0x487   :  { %v4604_v35 = vadd.f32 %v2338_v33, %v5706_v49  ;;  %4927 = vtanh.f32 %v2423_v34 }
 0x488   :  { %v2426_v36 = vmul.f32 0.5, %v4603_v32 }
 0x489   :  { %v4353_v37 = vpop.f32.mrb[20].mxu1  ;;  %v2425_v8 = vmul.f32 0.5, %v4604_v35 }
 0x48a   :  { %v4605_v38 = vadd.f32 %v4353_v37, %v5712_v54  ;;  %v2348_v39 = vpop.f32.mrb[21].mxu1  ;;  %4929 = vtanh.f32 %v2426_v36 }
 0x48b   :  { %v4606_v41 = vadd.f32 %v2348_v39, %v5718_v56 }
 0x48c   :  { %v2440_v11 = vmul.f32 0.5, %v4605_v38 }
 0x48d   :  { %v2439_v42 = vmul.f32 0.5, %v4606_v41  ;;  %v4356_v16 = vpop.f32.mrb[22].mxu1 }
 0x48e   :  { %4931 = vtanh.f32 %v2440_v11  ;;  %v4607_v47 = vadd.f32 %v4356_v16, %v5725_v62  ;;  %v2358_v18 = vpop.f32.mrb[23].mxu1 }
 0x48f   :  { %4933 = vtanh.f32 %v2439_v42  ;;  %v4608_v49 = vadd.f32 %v2358_v18, %v5730_v1 }
 0x490   :  { %4935 = vtanh.f32 %v2425_v8  ;;  %v2442_v10 = vmul.f32 0.5, %v4607_v47  ;;  %v4926_v21 = vpop.eup %4925 }
 0x491   :  { %v2441_v22 = vmul.f32 0.5, %v4608_v49  ;;  %v4359_v54 = vpop.f32.mrb[24].mxu1  ;;  %v4928_v52 = vpop.eup %4927  ;;  %v2432_v58 = vmul.f32 0.5, %v4926_v21 }
 0x492   :  { %4937 = vtanh.f32 %v2442_v10  ;;  %v4609_v13 = vadd.f32 %v4359_v54, %v5737_v7  ;;  %v2368_v56 = vpop.f32.mrb[25].mxu1  ;;  %v2431_v53 = vmul.f32 0.5, %v4928_v52 }
 0x493   :  { %4939 = vtanh.f32 %v2441_v22  ;;  %v4610_v20 = vadd.f32 %v2368_v56, %v5742_v9  ;;  %v2436_v57 = vadd.f32 0.5, %v2432_v58 }
 0x494   :  { %4941 = vtanh.f32 %v4609_v13  ;;  %v4930_v1 = vpop.eup %4929  ;;  %v2435_v2 = vadd.f32 0.5, %v2431_v53 }
 0x495   :  { %4943 = vtanh.f32 %v4610_v20  ;;  %v4362_v62 = vpop.f32.mrb[26].mxu1  ;;  %v2434_v24 = vmul.f32 0.5, %v4930_v1 }
 0x496   :  { %v4611_v23 = vadd.f32 %v4362_v62, %v5749_v15  ;;  %v2378_v51 = vpop.f32.mrb[27].mxu1 }
 0x497   :  { %v4612_v44 = vadd.f32 %v2378_v51, %v5754_v17  ;;  %v2438_v41 = vadd.f32 0.5, %v2434_v24  ;;  %v6064_v24 = vld [vmem:[%s6396_s2 + $0x58] sm:$0xff] }
 0x498   :  { %v4932_v45 = vpop.eup %4931  ;;  %4945 = vtanh.f32 %v4611_v23 }
 0x499   :  { %v4934_v7 = vpop.eup %4933  ;;  %v2448_v48 = vmul.f32 0.5, %v4932_v45  ;;  %4947 = vtanh.f32 %v4612_v44  ;;  %v4365_v55 = vpop.f32.mrb[28].mxu1 }
 0x49a   :  { %v4936_v9 = vpop.eup %4935  ;;  %v2447_v50 = vmul.f32 0.5, %v4934_v7  ;;  %v4613_v59 = vadd.f32 %v4365_v55, %v5761_v40  ;;  %v2388_v63 = vpop.f32.mrb[29].mxu1 }
 0x49b   :  { %v2452_v61 = vadd.f32 0.5, %v2448_v48  ;;  %v4614_v15 = vadd.f32 %v2388_v63, %v5766_v46  ;;  %v2433_v43 = vmul.f32 0.5, %v4936_v9  ;;  %v6001_v63 = vld [vmem:[%s6396_s2 + $0x10] sm:$0xff] }
 0x49c   :  { %v4938_v0 = vpop.eup %4937  ;;  %v2451_v17 = vadd.f32 0.5, %v2447_v50  ;;  %v2460_v5 = vmul.f32 0.5, %v4613_v59  ;;  %v5994_v59 = vld [vmem:[%s6396_s2 + $0x8] sm:$0xff] }
 0x49d   :  { %v4940_v6 = vpop.eup %4939  ;;  %v2450_v26 = vmul.f32 0.5, %v4938_v0  ;;  %v2459_v27 = vmul.f32 0.5, %v4614_v15  ;;  %v4368_v28 = vpop.f32.mrb[30].mxu1  ;;  %v2476_v30 = vmul.f32 %v2452_v61, %v5908_v3  ;;  %v2437_v42 = vadd.f32 0.5, %v2433_v43  ;;  %v6008_v61 = vld [vmem:[%s6396_s2 + $0x18] sm:$0xff]  ;;  %v6015_v15 = vld [vmem:[%s6396_s2 + $0x20] sm:$0xff] }
 0x49e   :  { %v4942_v29 = vpop.eup %4941  ;;  %v2449_v31 = vmul.f32 0.5, %v4940_v6  ;;  %4949 = vtanh.f32 %v2460_v5  ;;  %v4615_v40 = vadd.f32 %v4368_v28, %v5773_v60  ;;  %v2398_v32 = vpop.f32.mrb[31].mxu1  ;;  %v2475_v36 = vmul.f32 %v2451_v17, %v5910_v12  ;;  %v6022_v0 = vld [vmem:[%s6396_s2 + $0x28] sm:$0xff]  ;;  %v6043_v17 = vld [vmem:[%s6396_s2 + $0x40] sm:$0xff]  ;;  %v6057_v6 = vld [vmem:[%s6396_s2 + $0x50] sm:$0xff] }
 0x49f   :  { %v4944_v46 = vpop.eup %4943  ;;  %v2454_v33 = vadd.f32 0.5, %v2450_v26  ;;  %v2480_v34 = vmul.f32 %v4942_v29, %v2436_v57  ;;  %4951 = vtanh.f32 %v2459_v27  ;;  %v4616_v35 = vadd.f32 %v2398_v32, %v5778_v4  ;;  %v6029_v57 = vld [vmem:[%s6396_s2 + $0x30] sm:$0xff]  ;;  %v6050_v5 = vld [vmem:[%s6396_s2 + $0x48] sm:$0xff]  ;;  %v6071_v43 = vld [vmem:[%s6396_s2 + $0x60] sm:$0xff] }
 0x4a0   :  { %v2453_v37 = vadd.f32 0.5, %v2449_v31  ;;  %v2479_v38 = vmul.f32 %v4944_v46, %v2435_v2  ;;  %v2462_v39 = vmul.f32 0.5, %v4615_v40  ;;  %v6036_v2 = vld [vmem:[%s6396_s2 + $0x38] sm:$0xff]  ;;  %v6078_v26 = vld [vmem:[%s6396_s2 + $0x68] sm:$0xff]  ;;  %v6085_v27 = vld [vmem:[%s6396_s2 + $0x70] sm:$0xff] }
 0x4a1   :  { %v5977_v8 = vadd.f32 %v2480_v34, %v2476_v30  ;;  %v2461_v3 = vmul.f32 0.5, %v4616_v35  ;;  %v2478_v47 = vmul.f32 %v2454_v33, %v5916_v14  ;;  %v6092_v28 = vld [vmem:[%s6396_s2 + $0x78] sm:$0xff]  ;;  %v6101_v30 = vld [vmem:[%s6397_s3 + $0x8] sm:$0xff]  ;;  %v6107_v32 = vld [vmem:[%s6397_s3] sm:$0xff] }
 0x4a2   :  { %v4946_v11 = vpop.eup %4945  ;;  %v5979_v16 = vadd.f32 %v2479_v38, %v2475_v36  ;;  %4953 = vtanh.f32 %v2462_v39  ;;  %v2477_v12 = vmul.f32 %v2453_v37, %v5918_v19  ;;  %v6113_v35 = vld [vmem:[%s6397_s3 + $0x18] sm:$0xff]  ;;  %v6119_v39 = vld [vmem:[%s6397_s3 + $0x10] sm:$0xff] }
 0x4a3   :  { %v4948_v60 = vpop.eup %4947  ;;  %4955 = vtanh.f32 %v5977_v8  ;;  %v2482_v4 = vmul.f32 %v4946_v11, %v2438_v41 }
 0x4a4   :  { %4957 = vtanh.f32 %v5979_v16  ;;  %v2481_v18 = vmul.f32 %v4948_v60, %v2437_v42  ;;  %v6125_v42 = vld [vmem:[%s6397_s3 + $0x28] sm:$0xff] }
 0x4a5   :  { %v5985_v49 = vadd.f32 %v2482_v4, %v2478_v47  ;;  %4959 = vtanh.f32 %v2461_v3  ;;  %v6131_v4 = vld [vmem:[%s6397_s3 + $0x20] sm:$0xff] }
 0x4a6   :  { %v5987_v10 = vadd.f32 %v2481_v18, %v2477_v12 }
 0x4a7   :  { %4961 = vtanh.f32 %v5985_v49 }
 0x4a8   :  { %v4950_v22 = vpop.eup %4949  ;;  %4963 = vtanh.f32 %v5987_v10 }
 0x4a9   :  { %v4952_v54 = vpop.eup %4951  ;;  %v2468_v14 = vmul.f32 0.5, %v4950_v22 }
 0x4aa   :  { %v2467_v13 = vmul.f32 0.5, %v4952_v54 }
 0x4ab   :  { %v2472_v56 = vadd.f32 0.5, %v2468_v14 }
 0x4ac   :  { %v4954_v20 = vpop.eup %4953  ;;  %v2471_v21 = vadd.f32 0.5, %v2467_v13  ;;  %v6137_v13 = vld [vmem:[%s6397_s3 + $0x38] sm:$0xff] }
 0x4ad   :  { %v4956_v19 = vpop.eup %4955  ;;  %v2470_v52 = vmul.f32 0.5, %v4954_v20 }
 0x4ae   :  { %v4958_v62 = vpop.eup %4957  ;;  %v2492_v23 = vmul.f32 %v4956_v19, %v2472_v56 }
 0x4af   :  { %v4960_v51 = vpop.eup %4959  ;;  %v2474_v1 = vadd.f32 0.5, %v2470_v52  ;;  %v2491_v44 = vmul.f32 %v4958_v62, %v2471_v21  ;;  %v6143_v21 = vld [vmem:[%s6397_s3 + $0x30] sm:$0xff] }
 0x4b0   :  { %v2469_v45 = vmul.f32 0.5, %v4960_v51  ;;  %v6149_v51 = vld [vmem:[%s6397_s3 + $0x48] sm:$0xff] }
 0x4b1   :  { %v4962_v58 = vpop.eup %4961  ;;  %v4521_v53 = vpack.c.bf16 %v2492_v23, %v2491_v44 }
 0x4b2   :  { %v4964_v7 = vpop.eup %4963  ;;  %v2473_v48 = vadd.f32 0.5, %v2469_v45  ;;  %v2494_v55 = vmul.f32 %v4962_v58, %v2474_v1  ;;  %v6155_v45 = vld [vmem:[%s6397_s3 + $0x40] sm:$0xff] }
 0x4b3   :  { %4522 = vmatprep.subr.bf16.mxu0 %v4521_v53 }
 0x4b4   :  { %4524 = vmatpush3.bf16.msra.mxu0 %v4521_v53  ;;  %v2493_v9 = vmul.f32 %v4964_v7, %v2473_v48 }
 0x4b6   :  { %v4525_v50 = vpack.c.bf16 %v2494_v55, %v2493_v9  ;;  %v6161_v55 = vld [vmem:[%s6397_s3 + $0x58] sm:$0xff] }
 0x4b8   :  { %4526 = vmatprep.subr.bf16.mxu0 %v4525_v50 }
 0x4b9   :  { %4528 = vmatpush3.bf16.msra.mxu0 %v4525_v50 }
 0x4bc   :  { %4378 = vmatmul.mubr.msk.f32.vlgmr.msra.gmra.mrb[32].mxu0 %vm1466_vm2, %v5994_v59 }
 0x4bd   :  { %4380 = vmatprep.mubr.msk.f32.mxu0 %vm1466_vm2, %v6001_v63 }
 0x4c0   :  { %4381 = vmatmul.mubr.msk.f32.gmra.mrb[34].mxu0 %vm1466_vm2, %v6008_v61 }
 0x4c1   :  { %4383 = vmatprep.mubr.msk.f32.mxu0 %vm1466_vm2, %v6015_v15 }
 0x4c4   :  { %4384 = vmatmul.mubr.msk.f32.gmra.mrb[36].mxu0 %vm1466_vm2, %v6022_v0 }
 0x4c5   :  { %4386 = vmatprep.mubr.msk.f32.mxu0 %vm1466_vm2, %v6029_v57 }
 0x4c8   :  { %4387 = vmatmul.mubr.msk.f32.gmra.mrb[38].mxu0 %vm1466_vm2, %v6036_v2 }
 0x4c9   :  { %4389 = vmatprep.mubr.msk.f32.mxu0 %vm1466_vm2, %v6043_v17 }
 0x4cc   :  { %4390 = vmatmul.mubr.msk.f32.gmra.mrb[40].mxu0 %vm1466_vm2, %v6050_v5 }
 0x4cd   :  { %4392 = vmatprep.mubr.msk.f32.mxu0 %vm1466_vm2, %v6057_v6 }
 0x4d0   :  { %4393 = vmatmul.mubr.msk.f32.gmra.mrb[42].mxu0 %vm1466_vm2, %v6064_v24 }
 0x4d1   :  { %4395 = vmatprep.mubr.msk.f32.mxu0 %vm1466_vm2, %v6071_v43 }
 0x4d4   :  { %4396 = vmatmul.mubr.msk.f32.gmra.mrb[44].mxu0 %vm1466_vm2, %v6078_v26 }
 0x4d5   :  { %4398 = vmatprep.mubr.msk.f32.mxu0 %vm1466_vm2, %v6085_v27 }
 0x4d8   :  { %4399 = vmatmul.mubr.msk.f32.gmra.mrb[46].mxu0 %vm1466_vm2, %v6092_v28 }
 0x4d9   :  { %4441 = vmatprep.mubr.msk.f32.mxu0 %vm1466_vm2, %v5955_v25 }
 0x58f   :  { %v4379_v29 = vpop.f32.mrb[32].mxu0 }
 0x590   :  { %v4617_v31 = vadd.f32 %v6101_v30, %v4379_v29  ;;  %v2577_v40 = vpop.f32.mrb[33].mxu0 }
 0x591   :  { %v4618_v46 = vadd.f32 %v6107_v32, %v2577_v40 }
 0x592   :  { %v2673_v34 = vmul.f32 0.5, %v4617_v31  ;;  %v6167_v31 = vld [vmem:[%s6397_s3 + $0x50] sm:$0xff] }
 0x593   :  { %v4382_v33 = vpop.f32.mrb[34].mxu0  ;;  %v2672_v38 = vmul.f32 0.5, %v4618_v46 }
 0x594   :  { %v4619_v36 = vadd.f32 %v6113_v35, %v4382_v33  ;;  %v2587_v37 = vpop.f32.mrb[35].mxu0  ;;  %4965 = vtanh.f32 %v2673_v34 }
 0x595   :  { %v4620_v41 = vadd.f32 %v6119_v39, %v2587_v37  ;;  %4967 = vtanh.f32 %v2672_v38 }
 0x596   :  { %v2675_v3 = vmul.f32 0.5, %v4619_v36 }
 0x597   :  { %v4385_v11 = vpop.f32.mrb[36].mxu0  ;;  %v2674_v18 = vmul.f32 0.5, %v4620_v41 }
 0x598   :  { %v4621_v60 = vadd.f32 %v6125_v42, %v4385_v11  ;;  %v2597_v47 = vpop.f32.mrb[37].mxu0  ;;  %4969 = vtanh.f32 %v2675_v3  ;;  %v6173_v11 = vld [vmem:[%s6397_s3 + $0x68] sm:$0xff] }
 0x599   :  { %v4622_v12 = vadd.f32 %v6131_v4, %v2597_v47 }
 0x59a   :  { %v2689_v22 = vmul.f32 0.5, %v4621_v60 }
 0x59b   :  { %v2688_v54 = vmul.f32 0.5, %v4622_v12  ;;  %v4388_v14 = vpop.f32.mrb[38].mxu0 }
 0x59c   :  { %4971 = vtanh.f32 %v2689_v22  ;;  %v4623_v56 = vadd.f32 %v6137_v13, %v4388_v14  ;;  %v2607_v20 = vpop.f32.mrb[39].mxu0 }
 0x59d   :  { %4973 = vtanh.f32 %v2688_v54  ;;  %v4624_v19 = vadd.f32 %v6143_v21, %v2607_v20 }
 0x59e   :  { %4975 = vtanh.f32 %v2674_v18  ;;  %v2691_v52 = vmul.f32 0.5, %v4623_v56  ;;  %v4966_v53 = vpop.eup %4965  ;;  %v6179_v18 = vld [vmem:[%s6397_s3 + $0x60] sm:$0xff] }
 0x59f   :  { %v2690_v62 = vmul.f32 0.5, %v4624_v19  ;;  %v4391_v23 = vpop.f32.mrb[40].mxu0  ;;  %v4968_v7 = vpop.eup %4967  ;;  %v2681_v33 = vmul.f32 0.5, %v4966_v53 }
 0x5a0   :  { %4977 = vtanh.f32 %v2691_v52  ;;  %v4625_v1 = vadd.f32 %v6149_v51, %v4391_v23  ;;  %v2617_v44 = vpop.f32.mrb[41].mxu0  ;;  %v2680_v34 = vmul.f32 0.5, %v4968_v7 }
 0x5a1   :  { %4979 = vtanh.f32 %v2690_v62  ;;  %v4626_v58 = vadd.f32 %v6155_v45, %v2617_v44  ;;  %v2685_v14 = vadd.f32 0.5, %v2681_v33 }
 0x5a2   :  { %4981 = vtanh.f32 %v4625_v1  ;;  %v4970_v29 = vpop.eup %4969  ;;  %v2684_v56 = vadd.f32 0.5, %v2680_v34  ;;  %v6192_v34 = vld [vmem:[%s6397_s3 + $0x70] sm:$0xff] }
 0x5a3   :  { %4983 = vtanh.f32 %v4626_v58  ;;  %v4394_v48 = vpop.f32.mrb[42].mxu0  ;;  %v2683_v62 = vmul.f32 0.5, %v4970_v29 }
 0x5a4   :  { %v4627_v9 = vadd.f32 %v6161_v55, %v4394_v48  ;;  %v2627_v50 = vpop.f32.mrb[43].mxu0 }
 0x5a5   :  { %v4628_v40 = vadd.f32 %v6167_v31, %v2627_v50 }
 0x5a6   :  { %v4972_v46 = vpop.eup %4971  ;;  %4985 = vtanh.f32 %v4627_v9  ;;  %v6186_v9 = vld [vmem:[%s6397_s3 + $0x78] sm:$0xff]  ;;  %s5166_s3 = smov [#allocation3]  }
 0x5a7   :  { %v4974_v36 = vpop.eup %4973  ;;  %v2697_v37 = vmul.f32 0.5, %v4972_v46  ;;  %4987 = vtanh.f32 %v4628_v40  ;;  %v4397_v38 = vpop.f32.mrb[44].mxu0  ;;  %s3464_s25 = sshll.u32 %s5166_s3, 4  ;;  %s3465_s25 = int_to_ptr.vmem [resolvable:$true] %s3464_s25 }
 0x5a8   :  { %v4976_v41 = vpop.eup %4975  ;;  %v2696_v3 = vmul.f32 0.5, %v4974_v36  ;;  %v4629_v60 = vadd.f32 %v6173_v11, %v4397_v38  ;;  %v2637_v47 = vpop.f32.mrb[45].mxu0  ;;  %s5141_s2 = scalar_lea.vmem %s3465_s25, 512  ;;  %p5146_p1 = scmp.lt.s32.totalorder %s3465_s25, %s3465_s25 }
 0x5a9   :  { %v2701_v12 = vadd.f32 0.5, %v2697_v37  ;;  %v4630_v22 = vadd.f32 %v6179_v18, %v2637_v47  ;;  %v2682_v23 = vmul.f32 0.5, %v4976_v41  ;;  %p5142_p0 = scmp.ne.s32.totalorder %s3465_s25, %s5141_s2  ;;  %p5147_p2 = scmp.lt.s32.totalorder %s5141_s2, %s5141_s2 }
 0x5aa   :  { %v4978_v54 = vpop.eup %4977  ;;  %v2700_v20 = vadd.f32 0.5, %v2696_v3  ;;  %v2709_v19 = vmul.f32 0.5, %v4629_v60  ;;  %v2687_v3 = vadd.f32 0.5, %v2683_v62 }
 0x5ab   :  { %v4980_v52 = vpop.eup %4979  ;;  %v2699_v1 = vmul.f32 0.5, %v4978_v54  ;;  %v2708_v44 = vmul.f32 0.5, %v4630_v22  ;;  %v4400_v58 = vpop.f32.mrb[46].mxu0  ;;  %v2725_v7 = vmul.f32 %v2701_v12, %v5977_v8  ;;  %v2686_v22 = vadd.f32 0.5, %v2682_v23  ;;  %p5148_p3 = por %p5147_p2, %p5146_p1 }
 0x5ac   :  { %v4982_v53 = vpop.eup %4981  ;;  %v2698_v48 = vmul.f32 0.5, %v4980_v52  ;;  %4989 = vtanh.f32 %v2709_v19  ;;  %v4631_v50 = vadd.f32 %v6186_v9, %v4400_v58  ;;  %v2647_v40 = vpop.f32.mrb[47].mxu0  ;;  %v2724_v36 = vmul.f32 %v2700_v20, %v5979_v16 }
 0x5ad   :  { %v4984_v46 = vpop.eup %4983  ;;  %v2703_v33 = vadd.f32 0.5, %v2699_v1  ;;  %v2729_v29 = vmul.f32 %v4982_v53, %v2685_v14  ;;  %4991 = vtanh.f32 %v2708_v44  ;;  %v4632_v8 = vadd.f32 %v6192_v34, %v2647_v40  ;;  %p5149_p4 = pnand %p5148_p3, %p5142_p0 }
 0x5ae   :  { %v2702_v37 = vadd.f32 0.5, %v2698_v48  ;;  %v2728_v38 = vmul.f32 %v4984_v46, %v2684_v56  ;;  %v2711_v41 = vmul.f32 0.5, %v4631_v50 }
 0x5af   :  { %v6196_v60 = vadd.f32 %v2729_v29, %v2725_v7  ;;  %v2710_v47 = vmul.f32 0.5, %v4632_v8  ;;  %v2727_v19 = vmul.f32 %v2703_v33, %v5985_v49 }
 0x5b0   :  { %v4986_v12 = vpop.eup %4985  ;;  %v6198_v54 = vadd.f32 %v2728_v38, %v2724_v36  ;;  %4993 = vtanh.f32 %v2711_v41  ;;  %v2726_v16 = vmul.f32 %v2702_v37, %v5987_v10 }
 0x5b1   :  { %v4988_v14 = vpop.eup %4987  ;;  %4995 = vtanh.f32 %v6196_v60  ;;  %v2731_v52 = vmul.f32 %v4986_v12, %v2687_v3 }
 0x5b2   :  { %4997 = vtanh.f32 %v6198_v54  ;;  %v2730_v56 = vmul.f32 %v4988_v14, %v2686_v22 }
 0x5b3   :  { %v6204_v20 = vadd.f32 %v2731_v52, %v2727_v19  ;;  %4999 = vtanh.f32 %v2710_v47 }
 0x5b4   :  { %v6206_v62 = vadd.f32 %v2730_v56, %v2726_v16 }
 0x5b5   :  { %5001 = vtanh.f32 %v6204_v20 }
 0x5b6   :  { %v4990_v23 = vpop.eup %4989  ;;  %5003 = vtanh.f32 %v6206_v62 }
 0x5b7   :  { %v4992_v1 = vpop.eup %4991  ;;  %v2717_v49 = vmul.f32 0.5, %v4990_v23 }
 0x5b8   :  { %v2716_v44 = vmul.f32 0.5, %v4992_v1 }
 0x5b9   :  { %v2721_v58 = vadd.f32 0.5, %v2717_v49 }
 0x5ba   :  { %v4994_v53 = vpop.eup %4993  ;;  %v2720_v7 = vadd.f32 0.5, %v2716_v44 }
 0x5bb   :  { %v4996_v10 = vpop.eup %4995  ;;  %v2719_v48 = vmul.f32 0.5, %v4994_v53 }
 0x5bc   :  { %v4998_v50 = vpop.eup %4997  ;;  %v2741_v40 = vmul.f32 %v4996_v10, %v2721_v58 }
 0x5bd   :  { %v5000_v46 = vpop.eup %4999  ;;  %v2723_v33 = vadd.f32 0.5, %v2719_v48  ;;  %v2740_v29 = vmul.f32 %v4998_v50, %v2720_v7 }
 0x5be   :  { %v2718_v8 = vmul.f32 0.5, %v5000_v46 }
 0x5bf   :  { %v5002_v36 = vpop.eup %5001  ;;  %v4529_v37 = vpack.c.bf16 %v2741_v40, %v2740_v29 }
 0x5c0   :  { %v5004_v38 = vpop.eup %5003  ;;  %v2722_v41 = vadd.f32 0.5, %v2718_v8  ;;  %v2743_v3 = vmul.f32 %v5002_v36, %v2723_v33 }
 0x5c1   :  { %4530 = vmatprep.subr.bf16.mxu1 %v4529_v37 }
 0x5c2   :  { %4532 = vmatpush3.bf16.msra.mxu1 %v4529_v37  ;;  %v2742_v47 = vmul.f32 %v5004_v38, %v2722_v41 }
 0x5c4   :  { %v4533_v12 = vpack.c.bf16 %v2743_v3, %v2742_v47 }
 0x5c6   :  { %4534 = vmatprep.subr.bf16.mxu1 %v4533_v12 }
 0x5c7   :  { %4536 = vmatpush3.bf16.msra.mxu1 %v4533_v12 }
 0x5ca   :  { %4410 = vmatmul.mubr.msk.f32.vlgmr.msra.gmra.mrb[32].mxu1 %vm1466_vm2, %v5994_v59 }
 0x5cb   :  { %4412 = vmatprep.mubr.msk.f32.mxu1 %vm1466_vm2, %v6001_v63 }
 0x5ce   :  { %4413 = vmatmul.mubr.msk.f32.gmra.mrb[34].mxu1 %vm1466_vm2, %v6008_v61 }
 0x5cf   :  { %4415 = vmatprep.mubr.msk.f32.mxu1 %vm1466_vm2, %v6015_v15 }
 0x5d2   :  { %4416 = vmatmul.mubr.msk.f32.gmra.mrb[36].mxu1 %vm1466_vm2, %v6022_v0 }
 0x5d3   :  { %4418 = vmatprep.mubr.msk.f32.mxu1 %vm1466_vm2, %v6029_v57 }
 0x5d6   :  { %4419 = vmatmul.mubr.msk.f32.gmra.mrb[38].mxu1 %vm1466_vm2, %v6036_v2 }
 0x5d7   :  { %4421 = vmatprep.mubr.msk.f32.mxu1 %vm1466_vm2, %v6043_v17 }
 0x5da   :  { %4422 = vmatmul.mubr.msk.f32.gmra.mrb[40].mxu1 %vm1466_vm2, %v6050_v5 }
 0x5db   :  { %4424 = vmatprep.mubr.msk.f32.mxu1 %vm1466_vm2, %v6057_v6 }
 0x5de   :  { %4425 = vmatmul.mubr.msk.f32.gmra.mrb[42].mxu1 %vm1466_vm2, %v6064_v24 }
 0x5df   :  { %4427 = vmatprep.mubr.msk.f32.mxu1 %vm1466_vm2, %v6071_v43 }
 0x5e2   :  { %4428 = vmatmul.mubr.msk.f32.gmra.mrb[44].mxu1 %vm1466_vm2, %v6078_v26 }
 0x5e3   :  { %4430 = vmatprep.mubr.msk.f32.mxu1 %vm1466_vm2, %v6085_v27 }
 0x5e6   :  { %4431 = vmatmul.mubr.msk.f32.gmra.mrb[46].mxu1 %vm1466_vm2, %v6092_v28 }
 0x5e7   :  { %4473 = vmatprep.mubr.msk.f32.mxu1 %vm1466_vm2, %v5955_v25 }
 0x69d   :  { %v4411_v22 = vpop.f32.mrb[32].mxu1 }
 0x69e   :  { %v4633_v14 = vadd.f32 %v6101_v30, %v4411_v22  ;;  %v2826_v19 = vpop.f32.mrb[33].mxu1 }
 0x69f   :  { %v4634_v52 = vadd.f32 %v6107_v32, %v2826_v19 }
 0x6a0   :  { %v2922_v56 = vmul.f32 0.5, %v4633_v14 }
 0x6a1   :  { %v4414_v16 = vpop.f32.mrb[34].mxu1  ;;  %v2921_v49 = vmul.f32 0.5, %v4634_v52 }
 0x6a2   :  { %v4635_v23 = vadd.f32 %v6113_v35, %v4414_v16  ;;  %v2836_v1 = vpop.f32.mrb[35].mxu1  ;;  %5005 = vtanh.f32 %v2922_v56 }
 0x6a3   :  { %v4636_v44 = vadd.f32 %v6119_v39, %v2836_v1  ;;  %5007 = vtanh.f32 %v2921_v49 }
 0x6a4   :  { %v2924_v58 = vmul.f32 0.5, %v4635_v23 }
 0x6a5   :  { %v4417_v53 = vpop.f32.mrb[36].mxu1  ;;  %v2923_v48 = vmul.f32 0.5, %v4636_v44 }
 0x6a6   :  { %v4637_v7 = vadd.f32 %v6125_v42, %v4417_v53  ;;  %v2846_v25 = vpop.f32.mrb[37].mxu1  ;;  %5009 = vtanh.f32 %v2924_v58 }
 0x6a7   :  { %v4638_v10 = vadd.f32 %v6131_v4, %v2846_v25 }
 0x6a8   :  { %v2938_v50 = vmul.f32 0.5, %v4637_v7 }
 0x6a9   :  { %v2937_v40 = vmul.f32 0.5, %v4638_v10  ;;  %v4420_v46 = vpop.f32.mrb[38].mxu1 }
 0x6aa   :  { %5011 = vtanh.f32 %v2938_v50  ;;  %v4639_v33 = vadd.f32 %v6137_v13, %v4420_v46  ;;  %v2856_v29 = vpop.f32.mrb[39].mxu1 }
 0x6ab   :  { %5013 = vtanh.f32 %v2937_v40  ;;  %v4640_v8 = vadd.f32 %v6143_v21, %v2856_v29 }
 0x6ac   :  { %5015 = vtanh.f32 %v2923_v48  ;;  %v2940_v36 = vmul.f32 0.5, %v4639_v33  ;;  %v5006_v12 = vpop.eup %5005 }
 0x6ad   :  { %v2939_v37 = vmul.f32 0.5, %v4640_v8  ;;  %v4423_v38 = vpop.f32.mrb[40].mxu1  ;;  %v5008_v22 = vpop.eup %5007  ;;  %v2930_v1 = vmul.f32 0.5, %v5006_v12 }
 0x6ae   :  { %5017 = vtanh.f32 %v2940_v36  ;;  %v4641_v41 = vadd.f32 %v6149_v51, %v4423_v38  ;;  %v2866_v3 = vpop.f32.mrb[41].mxu1  ;;  %v2929_v49 = vmul.f32 0.5, %v5008_v22 }
 0x6af   :  { %5019 = vtanh.f32 %v2939_v37  ;;  %v4642_v47 = vadd.f32 %v6155_v45, %v2866_v3  ;;  %v2934_v33 = vadd.f32 0.5, %v2930_v1 }
 0x6b0   :  { %5021 = vtanh.f32 %v4641_v41  ;;  %v5010_v16 = vpop.eup %5009  ;;  %v2933_v29 = vadd.f32 0.5, %v2929_v49 }
 0x6b1   :  { %5023 = vtanh.f32 %v4642_v47  ;;  %v4426_v14 = vpop.f32.mrb[42].mxu1  ;;  %v2932_v38 = vmul.f32 0.5, %v5010_v16 }
 0x6b2   :  { %v4643_v19 = vadd.f32 %v6161_v55, %v4426_v14  ;;  %v2876_v52 = vpop.f32.mrb[43].mxu1 }
 0x6b3   :  { %v4644_v56 = vadd.f32 %v6167_v31, %v2876_v52 }
 0x6b4   :  { %v5012_v23 = vpop.eup %5011  ;;  %5025 = vtanh.f32 %v4643_v19 }
 0x6b5   :  { %v5014_v44 = vpop.eup %5013  ;;  %v2946_v58 = vmul.f32 0.5, %v5012_v23  ;;  %5027 = vtanh.f32 %v4644_v56  ;;  %v4429_v53 = vpop.f32.mrb[44].mxu1 }
 0x6b6   :  { %v5016_v7 = vpop.eup %5015  ;;  %v2945_v25 = vmul.f32 0.5, %v5014_v44  ;;  %v4645_v10 = vadd.f32 %v6173_v11, %v4429_v53  ;;  %v2886_v48 = vpop.f32.mrb[45].mxu1 }
 0x6b7   :  { %v2950_v50 = vadd.f32 0.5, %v2946_v58  ;;  %v4646_v40 = vadd.f32 %v6179_v18, %v2886_v48  ;;  %v2931_v41 = vmul.f32 0.5, %v5016_v7 }
 0x6b8   :  { %v5018_v46 = vpop.eup %5017  ;;  %v2949_v8 = vadd.f32 0.5, %v2945_v25  ;;  %v2958_v36 = vmul.f32 0.5, %v4645_v10  ;;  %v2936_v25 = vadd.f32 0.5, %v2932_v38 }
 0x6b9   :  { %v5020_v37 = vpop.eup %5019  ;;  %v2948_v3 = vmul.f32 0.5, %v5018_v46  ;;  %v2957_v47 = vmul.f32 0.5, %v4646_v40  ;;  %v4432_v12 = vpop.f32.mrb[46].mxu1  ;;  %v2974_v14 = vmul.f32 %v2950_v50, %v6196_v60  ;;  %v2935_v50 = vadd.f32 0.5, %v2931_v41 }
 0x6ba   :  { %v5022_v22 = vpop.eup %5021  ;;  %v2947_v19 = vmul.f32 0.5, %v5020_v37  ;;  %5029 = vtanh.f32 %v2958_v36  ;;  %v4647_v52 = vadd.f32 %v6186_v9, %v4432_v12  ;;  %v2896_v56 = vpop.f32.mrb[47].mxu1  ;;  %v2973_v16 = vmul.f32 %v2949_v8, %v6198_v54 }
 0x6bb   :  { %v5024_v23 = vpop.eup %5023  ;;  %v2952_v44 = vadd.f32 0.5, %v2948_v3  ;;  %v2978_v1 = vmul.f32 %v5022_v22, %v2934_v33  ;;  %5031 = vtanh.f32 %v2957_v47  ;;  %v4648_v49 = vadd.f32 %v6192_v34, %v2896_v56 }
 0x6bc   :  { %v2951_v58 = vadd.f32 0.5, %v2947_v19  ;;  %v2977_v53 = vmul.f32 %v5024_v23, %v2933_v29  ;;  %v2960_v7 = vmul.f32 0.5, %v4647_v52 }
 0x6bd   :  { %v6260_v10 = vadd.f32 %v2978_v1, %v2974_v14  ;;  %v2959_v60 = vmul.f32 0.5, %v4648_v49  ;;  %v2976_v33 = vmul.f32 %v2952_v44, %v6204_v20 }
 0x6be   :  { %v5026_v48 = vpop.eup %5025  ;;  %v6262_v40 = vadd.f32 %v2977_v53, %v2973_v16  ;;  %5033 = vtanh.f32 %v2960_v7  ;;  %v2975_v54 = vmul.f32 %v2951_v58, %v6206_v62 }
 0x6bf   :  { %v5028_v46 = vpop.eup %5027  ;;  %5035 = vtanh.f32 %v6260_v10  ;;  %v2980_v36 = vmul.f32 %v5026_v48, %v2936_v25 }
 0x6c0   :  { %5037 = vtanh.f32 %v6262_v40  ;;  %v2979_v29 = vmul.f32 %v5028_v46, %v2935_v50 }
 0x6c1   :  { %v6268_v8 = vadd.f32 %v2980_v36, %v2976_v33  ;;  %5039 = vtanh.f32 %v2959_v60 }
 0x6c2   :  { %v6270_v37 = vadd.f32 %v2979_v29, %v2975_v54 }
 0x6c3   :  { %5041 = vtanh.f32 %v6268_v8 }
 0x6c4   :  { %v5030_v38 = vpop.eup %5029  ;;  %5043 = vtanh.f32 %v6270_v37 }
 0x6c5   :  { %v5032_v41 = vpop.eup %5031  ;;  %v2966_v20 = vmul.f32 0.5, %v5030_v38 }
 0x6c6   :  { %v2965_v3 = vmul.f32 0.5, %v5032_v41 }
 0x6c7   :  { %v2970_v47 = vadd.f32 0.5, %v2966_v20 }
 0x6c8   :  { %v5034_v12 = vpop.eup %5033  ;;  %v2969_v22 = vadd.f32 0.5, %v2965_v3 }
 0x6c9   :  { %v5036_v62 = vpop.eup %5035  ;;  %v2968_v14 = vmul.f32 0.5, %v5034_v12 }
 0x6ca   :  { %v5038_v19 = vpop.eup %5037  ;;  %v2990_v52 = vmul.f32 %v5036_v62, %v2970_v47 }
 0x6cb   :  { %v5040_v56 = vpop.eup %5039  ;;  %v2972_v23 = vadd.f32 0.5, %v2968_v14  ;;  %v2989_v44 = vmul.f32 %v5038_v19, %v2969_v22 }
 0x6cc   :  { %v2967_v1 = vmul.f32 0.5, %v5040_v56 }
 0x6cd   :  { %v5042_v49 = vpop.eup %5041  ;;  %v4537_v16 = vpack.c.bf16 %v2990_v52, %v2989_v44 }
 0x6ce   :  { %v5044_v58 = vpop.eup %5043  ;;  %v2971_v53 = vadd.f32 0.5, %v2967_v1  ;;  %v2992_v7 = vmul.f32 %v5042_v49, %v2972_v23 }
 0x6cf   :  { %4538 = vmatprep.subr.bf16.mxu0 %v4537_v16 }
 0x6d0   :  { %4540 = vmatpush3.bf16.msra.mxu0 %v4537_v16  ;;  %v2991_v25 = vmul.f32 %v5044_v58, %v2971_v53 }
 0x6d2   :  { %v4541_v60 = vpack.c.bf16 %v2992_v7, %v2991_v25 }
 0x6d4   :  { %4542 = vmatprep.subr.bf16.mxu0 %v4541_v60 }
 0x6d5   :  { %4544 = vmatpush3.bf16.msra.mxu0 %v4541_v60 }
 0x6d8   :  { %4442 = vmatmul.mubr.msk.f32.vlgmr.msra.gmra.mrb[48].mxu0 %vm1466_vm2, %v5994_v59 }
 0x6d9   :  { %4444 = vmatprep.mubr.msk.f32.mxu0 %vm1466_vm2, %v6001_v63 }
 0x6dc   :  { %4445 = vmatmul.mubr.msk.f32.gmra.mrb[50].mxu0 %vm1466_vm2, %v6008_v61 }
 0x6dd   :  { %4447 = vmatprep.mubr.msk.f32.mxu0 %vm1466_vm2, %v6015_v15 }
 0x6e0   :  { %4448 = vmatmul.mubr.msk.f32.gmra.mrb[52].mxu0 %vm1466_vm2, %v6022_v0 }
 0x6e1   :  { %4450 = vmatprep.mubr.msk.f32.mxu0 %vm1466_vm2, %v6029_v57 }
 0x6e4   :  { %4451 = vmatmul.mubr.msk.f32.gmra.mrb[54].mxu0 %vm1466_vm2, %v6036_v2 }
 0x6e5   :  { %4453 = vmatprep.mubr.msk.f32.mxu0 %vm1466_vm2, %v6043_v17 }
 0x6e8   :  { %4454 = vmatmul.mubr.msk.f32.gmra.mrb[56].mxu0 %vm1466_vm2, %v6050_v5 }
 0x6e9   :  { %4456 = vmatprep.mubr.msk.f32.mxu0 %vm1466_vm2, %v6057_v6 }
 0x6ec   :  { %4457 = vmatmul.mubr.msk.f32.gmra.mrb[58].mxu0 %vm1466_vm2, %v6064_v24 }
 0x6ed   :  { %4459 = vmatprep.mubr.msk.f32.mxu0 %vm1466_vm2, %v6071_v43 }
 0x6f0   :  { %4460 = vmatmul.mubr.msk.f32.gmra.mrb[60].mxu0 %vm1466_vm2, %v6078_v26 }
 0x6f1   :  { %4462 = vmatprep.mubr.msk.f32.mxu0 %vm1466_vm2, %v6085_v27 }
 0x6f4   :  { %4463 = vmatmul.mubr.msk.f32.gmra.mrb[62].mxu0 %vm1466_vm2, %v6092_v28 }
 0x7ab   :  { %v4443_v48 = vpop.f32.mrb[48].mxu0 }
 0x7ac   :  { %v4649_v50 = vadd.f32 %v6101_v30, %v4443_v48  ;;  %v3075_v46 = vpop.f32.mrb[49].mxu0 }
 0x7ad   :  { %v4650_v33 = vadd.f32 %v6107_v32, %v3075_v46 }
 0x7ae   :  { %v3171_v54 = vmul.f32 0.5, %v4649_v50 }
 0x7af   :  { %v4446_v36 = vpop.f32.mrb[50].mxu0  ;;  %v3170_v41 = vmul.f32 0.5, %v4650_v33 }
 0x7b0   :  { %v4651_v29 = vadd.f32 %v6113_v35, %v4446_v36  ;;  %v3085_v38 = vpop.f32.mrb[51].mxu0  ;;  %5045 = vtanh.f32 %v3171_v54 }
 0x7b1   :  { %v4652_v20 = vadd.f32 %v6119_v39, %v3085_v38  ;;  %5047 = vtanh.f32 %v3170_v41 }
 0x7b2   :  { %v3173_v3 = vmul.f32 0.5, %v4651_v29 }
 0x7b3   :  { %v4449_v47 = vpop.f32.mrb[52].mxu0  ;;  %v3172_v14 = vmul.f32 0.5, %v4652_v20 }
 0x7b4   :  { %v4653_v12 = vadd.f32 %v6125_v42, %v4449_v47  ;;  %v3095_v22 = vpop.f32.mrb[53].mxu0  ;;  %5049 = vtanh.f32 %v3173_v3 }
 0x7b5   :  { %v4654_v62 = vadd.f32 %v6131_v4, %v3095_v22 }
 0x7b6   :  { %v3187_v19 = vmul.f32 0.5, %v4653_v12 }
 0x7b7   :  { %v3186_v52 = vmul.f32 0.5, %v4654_v62  ;;  %v4452_v56 = vpop.f32.mrb[54].mxu0 }
 0x7b8   :  { %5051 = vtanh.f32 %v3187_v19  ;;  %v4655_v23 = vadd.f32 %v6137_v13, %v4452_v56  ;;  %v3105_v44 = vpop.f32.mrb[55].mxu0 }
 0x7b9   :  { %5053 = vtanh.f32 %v3186_v52  ;;  %v4656_v1 = vadd.f32 %v6143_v21, %v3105_v44 }
 0x7ba   :  { %5055 = vtanh.f32 %v3172_v14  ;;  %v3189_v49 = vmul.f32 0.5, %v4655_v23  ;;  %v5046_v60 = vpop.eup %5045 }
 0x7bb   :  { %v3188_v16 = vmul.f32 0.5, %v4656_v1  ;;  %v4455_v58 = vpop.f32.mrb[56].mxu0  ;;  %v5048_v48 = vpop.eup %5047  ;;  %v3179_v38 = vmul.f32 0.5, %v5046_v60 }
 0x7bc   :  { %5057 = vtanh.f32 %v3189_v49  ;;  %v4657_v53 = vadd.f32 %v6149_v51, %v4455_v58  ;;  %v3115_v7 = vpop.f32.mrb[57].mxu0  ;;  %v3178_v41 = vmul.f32 0.5, %v5048_v48 }
 0x7bd   :  { %5059 = vtanh.f32 %v3188_v16  ;;  %v4658_v25 = vadd.f32 %v6155_v45, %v3115_v7  ;;  %v3183_v23 = vadd.f32 0.5, %v3179_v38 }
 0x7be   :  { %5061 = vtanh.f32 %v4657_v53  ;;  %v5050_v36 = vpop.eup %5049  ;;  %v3182_v44 = vadd.f32 0.5, %v3178_v41 }
 0x7bf   :  { %5063 = vtanh.f32 %v4658_v25  ;;  %v4458_v50 = vpop.f32.mrb[58].mxu0  ;;  %v3181_v58 = vmul.f32 0.5, %v5050_v36 }
 0x7c0   :  { %v4659_v46 = vadd.f32 %v6161_v55, %v4458_v50  ;;  %v3125_v33 = vpop.f32.mrb[59].mxu0 }
 0x7c1   :  { %v4660_v54 = vadd.f32 %v6167_v31, %v3125_v33 }
 0x7c2   :  { %v5052_v29 = vpop.eup %5051  ;;  %5065 = vtanh.f32 %v4659_v46 }
 0x7c3   :  { %v5054_v20 = vpop.eup %5053  ;;  %v3195_v3 = vmul.f32 0.5, %v5052_v29  ;;  %5067 = vtanh.f32 %v4660_v54  ;;  %v4461_v47 = vpop.f32.mrb[60].mxu0 }
 0x7c4   :  { %v5056_v12 = vpop.eup %5055  ;;  %v3194_v22 = vmul.f32 0.5, %v5054_v20  ;;  %v4661_v62 = vadd.f32 %v6173_v11, %v4461_v47  ;;  %v3135_v14 = vpop.f32.mrb[61].mxu0  ;;  %v3185_v47 = vadd.f32 0.5, %v3181_v58 }
 0x7c5   :  { %v3199_v19 = vadd.f32 0.5, %v3195_v3  ;;  %v4662_v52 = vadd.f32 %v6179_v18, %v3135_v14  ;;  %v3180_v53 = vmul.f32 0.5, %v5056_v12 }
 0x7c6   :  { %v5058_v56 = vpop.eup %5057  ;;  %v3198_v1 = vadd.f32 0.5, %v3194_v22  ;;  %v3207_v49 = vmul.f32 0.5, %v4661_v62 }
 0x7c7   :  { %v5060_v16 = vpop.eup %5059  ;;  %v3197_v7 = vmul.f32 0.5, %v5058_v56  ;;  %v3206_v25 = vmul.f32 0.5, %v4662_v52  ;;  %v4464_v60 = vpop.f32.mrb[62].mxu0  ;;  %v3223_v50 = vmul.f32 %v3199_v19, %v6260_v10  ;;  %v3184_v62 = vadd.f32 0.5, %v3180_v53 }
 0x7c8   :  { %v5062_v48 = vpop.eup %5061  ;;  %v3196_v46 = vmul.f32 0.5, %v5060_v16  ;;  %5069 = vtanh.f32 %v3207_v49  ;;  %v4663_v11 = vadd.f32 %v6186_v9, %v4464_v60  ;;  %v3145_v33 = vpop.f32.mrb[63].mxu0  ;;  %v3222_v36 = vmul.f32 %v3198_v1, %v6262_v40 }
 0x7c9   :  { %v5064_v18 = vpop.eup %5063  ;;  %v3201_v54 = vadd.f32 0.5, %v3197_v7  ;;  %v3227_v29 = vmul.f32 %v5062_v48, %v3183_v23  ;;  %5071 = vtanh.f32 %v3206_v25  ;;  %v4664_v38 = vadd.f32 %v6192_v34, %v3145_v33 }
 0x7ca   :  { %v3200_v41 = vadd.f32 0.5, %v3196_v46  ;;  %v3226_v20 = vmul.f32 %v5064_v18, %v3182_v44  ;;  %v3209_v3 = vmul.f32 0.5, %v4663_v11 }
 0x7cb   :  { %v6322_v12 = vadd.f32 %v3227_v29, %v3223_v50  ;;  %v3208_v10 = vmul.f32 0.5, %v4664_v38  ;;  %v3225_v19 = vmul.f32 %v3201_v54, %v6268_v8 }
 0x7cc   :  { %v5066_v22 = vpop.eup %5065  ;;  %v6324_v14 = vadd.f32 %v3226_v20, %v3222_v36  ;;  %5073 = vtanh.f32 %v3209_v3  ;;  %v3224_v40 = vmul.f32 %v3200_v41, %v6270_v37 }
 0x7cd   :  { %v5068_v9 = vpop.eup %5067  ;;  %5075 = vtanh.f32 %v6322_v12  ;;  %v3229_v34 = vmul.f32 %v5066_v22, %v3185_v47 }
 0x7ce   :  { %5077 = vtanh.f32 %v6324_v14  ;;  %v3228_v52 = vmul.f32 %v5068_v9, %v3184_v62 }
 0x7cf   :  { %v6330_v56 = vadd.f32 %v3229_v34, %v3225_v19  ;;  %5079 = vtanh.f32 %v3208_v10 }
 0x7d0   :  { %v6332_v23 = vadd.f32 %v3228_v52, %v3224_v40 }
 0x7d1   :  { %5081 = vtanh.f32 %v6330_v56 }
 0x7d2   :  { %v5070_v44 = vpop.eup %5069  ;;  %5083 = vtanh.f32 %v6332_v23 }
 0x7d3   :  { %v5072_v1 = vpop.eup %5071  ;;  %v3215_v8 = vmul.f32 0.5, %v5070_v44 }
 0x7d4   :  { %v3214_v49 = vmul.f32 0.5, %v5072_v1 }
 0x7d5   :  { %v3219_v16 = vadd.f32 0.5, %v3215_v8 }
 0x7d6   :  { %v5074_v58 = vpop.eup %5073  ;;  %v3218_v53 = vadd.f32 0.5, %v3214_v49 }
 0x7d7   :  { %v5076_v37 = vpop.eup %5075  ;;  %v3217_v7 = vmul.f32 0.5, %v5074_v58 }
 0x7d8   :  { %v5078_v25 = vpop.eup %5077  ;;  %v3239_v60 = vmul.f32 %v5076_v37, %v3219_v16 }
 0x7d9   :  { %v5080_v48 = vpop.eup %5079  ;;  %v3221_v50 = vadd.f32 0.5, %v3217_v7  ;;  %v3238_v46 = vmul.f32 %v5078_v25, %v3218_v53 }
 0x7da   :  { %v3216_v11 = vmul.f32 0.5, %v5080_v48 }
 0x7db   :  { %v5082_v33 = vpop.eup %5081  ;;  %v4545_v18 = vpack.c.bf16 %v3239_v60, %v3238_v46 }
 0x7dc   :  { %v5084_v54 = vpop.eup %5083  ;;  %v3220_v29 = vadd.f32 0.5, %v3216_v11  ;;  %v3241_v38 = vmul.f32 %v5082_v33, %v3221_v50 }
 0x7dd   :  { %4546 = vmatprep.subr.bf16.mxu1 %v4545_v18 }
 0x7de   :  { %4548 = vmatpush3.bf16.msra.mxu1 %v4545_v18  ;;  %v3240_v36 = vmul.f32 %v5084_v54, %v3220_v29 }
 0x7e0   :  { %v4549_v41 = vpack.c.bf16 %v3241_v38, %v3240_v36 }
 0x7e2   :  { %4550 = vmatprep.subr.bf16.mxu1 %v4549_v41 }
 0x7e3   :  { %4552 = vmatpush3.bf16.msra.mxu1 %v4549_v41 }
 0x7e6   :  { %4474 = vmatmul.mubr.msk.f32.vlgmr.msra.gmra.mrb[48].mxu1 %vm1466_vm2, %v5994_v59 }
 0x7e7   :  { %4476 = vmatprep.mubr.msk.f32.mxu1 %vm1466_vm2, %v6001_v63 }
 0x7ea   :  { %4477 = vmatmul.mubr.msk.f32.gmra.mrb[50].mxu1 %vm1466_vm2, %v6008_v61 }
 0x7eb   :  { %4479 = vmatprep.mubr.msk.f32.mxu1 %vm1466_vm2, %v6015_v15 }
 0x7ee   :  { %4480 = vmatmul.mubr.msk.f32.gmra.mrb[52].mxu1 %vm1466_vm2, %v6022_v0 }
 0x7ef   :  { %4482 = vmatprep.mubr.msk.f32.mxu1 %vm1466_vm2, %v6029_v57 }
 0x7f2   :  { %4483 = vmatmul.mubr.msk.f32.gmra.mrb[54].mxu1 %vm1466_vm2, %v6036_v2 }
 0x7f3   :  { %4485 = vmatprep.mubr.msk.f32.mxu1 %vm1466_vm2, %v6043_v17 }
 0x7f6   :  { %4486 = vmatmul.mubr.msk.f32.gmra.mrb[56].mxu1 %vm1466_vm2, %v6050_v5 }
 0x7f7   :  { %4488 = vmatprep.mubr.msk.f32.mxu1 %vm1466_vm2, %v6057_v6 }
 0x7fa   :  { %4489 = vmatmul.mubr.msk.f32.gmra.mrb[58].mxu1 %vm1466_vm2, %v6064_v24 }
 0x7fb   :  { %4491 = vmatprep.mubr.msk.f32.mxu1 %vm1466_vm2, %v6071_v43 }
 0x7fe   :  { %4492 = vmatmul.mubr.msk.f32.gmra.mrb[64].mxu1 %vm1466_vm2, %v6078_v26 }
 0x7ff   :  { %4494 = vmatprep.mubr.msk.f32.mxu1 %vm1466_vm2, %v6085_v27 }
 0x802   :  { %4495 = vmatmul.mubr.msk.f32.gmra.mrb[66].mxu1 %vm1466_vm2, %v6092_v28 }
 0x8b9   :  { %v4475_v59 = vpop.f32.mrb[48].mxu1 }
 0x8ba   :  { %v3320_v63 = vpop.f32.mrb[49].mxu1  ;;  %v4665_v61 = vadd.f32 %v6101_v30, %v4475_v59 }
 0x8bb   :  { %v4666_v15 = vadd.f32 %v6107_v32, %v3320_v63 }
 0x8bc   :  { %v3408_v2 = vmul.f32 0.5, %v4665_v61 }
 0x8bd   :  { %v4478_v0 = vpop.f32.mrb[50].mxu1  ;;  %v3407_v5 = vmul.f32 0.5, %v4666_v15 }
 0x8be   :  { %v3330_v57 = vpop.f32.mrb[51].mxu1  ;;  %v4667_v17 = vadd.f32 %v6113_v35, %v4478_v0  ;;  %5085 = vtanh.f32 %v3408_v2 }
 0x8bf   :  { %v4668_v6 = vadd.f32 %v6119_v39, %v3330_v57  ;;  %5087 = vtanh.f32 %v3407_v5 }
 0x8c0   :  { %v3410_v28 = vmul.f32 0.5, %v4667_v17 }
 0x8c1   :  { %v4481_v24 = vpop.f32.mrb[52].mxu1  ;;  %v3409_v30 = vmul.f32 0.5, %v4668_v6 }
 0x8c2   :  { %v4669_v43 = vadd.f32 %v6125_v42, %v4481_v24  ;;  %v3340_v26 = vpop.f32.mrb[53].mxu1 }
 0x8c3   :  { %v4670_v27 = vadd.f32 %v6131_v4, %v3340_v26 }
 0x8c4   :  { %v3424_v20 = vmul.f32 0.5, %v4669_v43 }
 0x8c5   :  { %v3423_v32 = vmul.f32 0.5, %v4670_v27  ;;  %v4484_v3 = vpop.f32.mrb[54].mxu1 }
 0x8c6   :  { %5089 = vtanh.f32 %v3424_v20  ;;  %v4671_v47 = vadd.f32 %v6137_v13, %v4484_v3  ;;  %v3350_v35 = vpop.f32.mrb[55].mxu1 }
 0x8c7   :  { %5091 = vtanh.f32 %v3423_v32  ;;  %v4672_v39 = vadd.f32 %v6143_v21, %v3350_v35 }
 0x8c8   :  { %5093 = vtanh.f32 %v3410_v28  ;;  %v3426_v10 = vmul.f32 0.5, %v4671_v47  ;;  %v5086_v13 = vpop.eup %5085 }
 0x8c9   :  { %5095 = vtanh.f32 %v3409_v30  ;;  %v3425_v42 = vmul.f32 0.5, %v4672_v39  ;;  %v4487_v22 = vpop.f32.mrb[56].mxu1  ;;  %v5088_v21 = vpop.eup %5087  ;;  %v3416_v8 = vmul.f32 0.5, %v5086_v13 }
 0x8ca   :  { %5097 = vtanh.f32 %v3426_v10  ;;  %v4673_v4 = vadd.f32 %v6149_v51, %v4487_v22  ;;  %v3360_v62 = vpop.f32.mrb[57].mxu1  ;;  %v3415_v58 = vmul.f32 0.5, %v5088_v21 }
 0x8cb   :  { %5099 = vtanh.f32 %v3425_v42  ;;  %v4674_v9 = vadd.f32 %v6155_v45, %v3360_v62  ;;  %v3420_v48 = vadd.f32 0.5, %v3416_v8 }
 0x8cc   :  { %5101 = vtanh.f32 %v4673_v4  ;;  %v3419_v33 = vadd.f32 0.5, %v3415_v58 }
 0x8cd   :  { %5103 = vtanh.f32 %v4674_v9  ;;  %v4490_v19 = vpop.f32.mrb[58].mxu1 }
 0x8ce   :  { %v4675_v34 = vadd.f32 %v6161_v55, %v4490_v19  ;;  %v3370_v40 = vpop.f32.mrb[59].mxu1 }
 0x8cf   :  { %v4676_v52 = vadd.f32 %v6167_v31, %v3370_v40 }
 0x8d0   :  { %v5090_v44 = vpop.eup %5089  ;;  %5105 = vtanh.f32 %v4675_v34 }
 0x8d1   :  { %v5092_v1 = vpop.eup %5091  ;;  %v3432_v49 = vmul.f32 0.5, %v5090_v44  ;;  %5107 = vtanh.f32 %v4676_v52  ;;  %v4493_v51 = vpop.f32.mrb[64].mxu1 }
 0x8d2   :  { %v5094_v16 = vpop.eup %5093  ;;  %v3431_v45 = vmul.f32 0.5, %v5092_v1  ;;  %v3380_v53 = vpop.f32.mrb[65].mxu1 }
 0x8d3   :  { %v5096_v37 = vpop.eup %5095  ;;  %v3436_v7 = vadd.f32 0.5, %v3432_v49  ;;  %v3418_v50 = vmul.f32 0.5, %v5094_v16 }
 0x8d4   :  { %v5098_v25 = vpop.eup %5097  ;;  %v3435_v60 = vadd.f32 0.5, %v3431_v45  ;;  %v3417_v18 = vmul.f32 0.5, %v5096_v37 }
 0x8d5   :  { %v5100_v55 = vpop.eup %5099  ;;  %v3434_v46 = vmul.f32 0.5, %v5098_v25  ;;  %v4496_v31 = vpop.f32.mrb[66].mxu1  ;;  %v3444_v36 = vmul.f32 %v3436_v7, %v6322_v12  ;;  %v3422_v0 = vadd.f32 0.5, %v3418_v50 }
 0x8d6   :  { %v5102_v11 = vpop.eup %5101  ;;  %v3433_v54 = vmul.f32 0.5, %v5100_v55  ;;  %v3388_v29 = vpop.f32.mrb[67].mxu1  ;;  %v3443_v63 = vmul.f32 %v3435_v60, %v6324_v14  ;;  %v3421_v17 = vadd.f32 0.5, %v3417_v18 }
 0x8d7   :  { %v5104_v38 = vpop.eup %5103  ;;  %v3438_v41 = vadd.f32 0.5, %v3434_v46  ;;  %v3448_v59 = vmul.f32 %v5102_v11, %v3420_v48 }
 0x8d8   :  { %v3437_v61 = vadd.f32 0.5, %v3433_v54  ;;  %v3447_v15 = vmul.f32 %v5104_v38, %v3419_v33 }
 0x8d9   :  { %v3452_v57 = vadd.f32 %v3448_v59, %v3444_v36  ;;  %v3446_v24 = vmul.f32 %v3438_v41, %v6330_v56 }
 0x8da   :  { %v5106_v2 = vpop.eup %5105  ;;  %v3451_v5 = vadd.f32 %v3447_v15, %v3443_v63  ;;  %v3445_v12 = vmul.f32 %v3437_v61, %v6332_v23 }
 0x8db   :  { %v5108_v6 = vpop.eup %5107  ;;  %3456 = vst [vmem:[#allocation3 + $0x8] sm:$0xff] %v3452_v57  ;;  %v3450_v43 = vmul.f32 %v5106_v2, %v3422_v0 }
 0x8dc   :  { %3455 = vst [vmem:[#allocation3] sm:$0xff] %v3451_v5  ;;  %v3449_v26 = vmul.f32 %v5108_v6, %v3421_v17 }
 0x8dd   :  { %v3454_v27 = vadd.f32 %v3450_v43, %v3446_v24 }
 0x8de   :  { %v3453_v14 = vadd.f32 %v3449_v26, %v3445_v12 }
 0x8df   :  { %3458 = vst [vmem:[#allocation3 + $0x18] sm:$0xff] %v3454_v27 }
 0x8e0   :  { %3457 = vst [vmem:[#allocation3 + $0x10] sm:$0xff] %v3453_v14 }
 0x8e1   :  { %5152 = shalt.err (!%p5149_p4)
}
 0x8e2   :  { %s5153_s28 = scalar_lea.hbm %s6398_s4, 512 }
 0x8e3   :  { %p5154_p5 = scmp.ne.s32.totalorder %s6398_s4, %s5153_s28  ;;  %p5157_p6 = scmp.lt.u32.totalorder %s5153_s28, %s6398_s4 }
 0x8e5   :  { %p5159_p7 = pnand %p5157_p6, %p5154_p5 }
 0x8e7   :  { %5162 = shalt.err (!%p5159_p7)
}
 0x8e8   :  { %s5167_s6 = smov 128   ;;  %s5168_s7 = smov 8  }
 0x8e9   :  { %3470 = dma.vmem_to_hbm [thread:$0]  %s3465_s25, 512, %s6398_s4, [#allocation4], %s5167_s6, %s5167_s6, %s5168_s7  }
 0x8ea   :  { %5163 = dma.done.wait [#allocation4], 512  }
 0x8eb   :  { %5164 = vsyncadd [#allocation4], 4294966784 }
 0x8ec   :  { %3474 = vsyncpa [#allocation4], 1 }

</bundles_post_ra>
